<compile_context>
chip_gen: v5e
topology: v5e:2x2
jax: 0.10.0
libtpu: 0.0.40
codegen_flags: <defaults>
</compile_context>

<pallas_src>
from functools import partial

import jax
import jax.numpy as jnp
from jax import lax
from jax.experimental import pallas as pl
from jax.experimental.pallas import tpu as pltpu
import numpy as np


def _linear_attention_kernel(x_ref, wqkv_ref, wout_ref, bout_ref, g1_ref, g2_ref,
                             mkmax_ref, smem_ref, ctxmem_ref, o_ref, *,
                             heads, dim_head, scale, eps):
    # x_ref      : (1, C, N)      f32  one image; channels on sublanes, pixels on lanes
    # wqkv_ref   : (3*hidden, C)  bf16 to_qkv 1x1-conv weight (untransposed, standard MK)
    # wout_ref   : (C, hidden)    bf16 to_out 1x1-conv weight
    # bout_ref   : (C, 1)         f32  to_out bias
    # g1_ref     : (C, 1)         f32  (gamma_in  + 1) * sqrt(C)   (pre-folded)
    # g2_ref     : (C, 1)         f32  (gamma_out + 1) * sqrt(C)   (pre-folded)
    # mkmax_ref  : (hidden, 1)    f32  max over memory tokens of mem-k, per (h, d)
    # smem_ref   : (hidden, 1)    f32  sum_m exp(mem_k - mkmax), per (h, d)
    # ctxmem_ref : (heads, e, d)  f32  sum_m mem_v[h,e,m] * exp(mem_k[h,d,m] - mkmax[h,d])
    # o_ref      : (1, C, N)      f32
    N = x_ref.shape[2]
    hidden = heads * dim_head

    x = x_ref[0]                                                   # (C, N) f32

    # ---- input RMSNorm over channels (sublane axis), f32 ---------------------
    ssq = jnp.sum(x * x, axis=0, keepdims=True)                    # (1, N)
    xn = x * lax.rsqrt(jnp.maximum(ssq, eps * eps)) * g1_ref[...]

    # ---- to_qkv 1x1 conv: one bf16 matmul, f32 accumulation ------------------
    qkv = jnp.dot(wqkv_ref[...], xn.astype(jnp.bfloat16),
                  preferred_element_type=jnp.float32)              # (3*hidden, N) f32

    q = qkv[0 * hidden:1 * hidden].reshape(heads, dim_head, N)     # (h, d, N)
    kf = qkv[1 * hidden:2 * hidden]                                # (hidden, N) rows = (h,d)
    vf = qkv[2 * hidden:3 * hidden]                                # (hidden, N) rows = (h,e)

    # ---- q softmax over head-dim (axis=1), f32 --------------------------------
    q = jnp.exp(q - jnp.max(q, axis=1, keepdims=True))
    q = q * pl.reciprocal(jnp.sum(q, axis=1, keepdims=True), approx=True)

    # ---- k "softmax over tokens" (pixels + memory kv) -------------------------
    # Joint max with the precomputed memory-token max; keep exp(k - m)
    # UNNORMALIZED and fold the normalizer r into the tiny context below.
    m = jnp.maximum(jnp.max(kf, axis=1, keepdims=True), mkmax_ref[...])   # (hidden, 1)
    ek = jnp.exp(kf - m)                                                  # (hidden, N) f32
    mem_scale = jnp.exp(mkmax_ref[...] - m)                               # (hidden, 1)
    r = pl.reciprocal(jnp.sum(ek, axis=1, keepdims=True)
                      + smem_ref[...] * mem_scale, approx=True)           # (hidden, 1)

    # ---- pixel context: ONE fused (hidden,N)@(N,hidden) bf16 matmul -----------
    # big[e_flat, d_flat] = sum_n v[e_flat, n] * exp(k - m)[d_flat, n];
    # per-head contexts are the diagonal dim_head x dim_head blocks.
    big = lax.dot_general(vf.astype(jnp.bfloat16), ek.astype(jnp.bfloat16),
                          dimension_numbers=(((1,), (1,)), ((), ())),
                          preferred_element_type=jnp.float32)             # (hidden, hidden)
    ctx_pix = jnp.stack(
        [big[h * dim_head:(h + 1) * dim_head, h * dim_head:(h + 1) * dim_head]
         for h in range(heads)], axis=0)                                   # (heads, e, d)

    # ---- add memory-kv context, fold normalizer r and the q scale -------------
    ms = mem_scale.reshape(heads, dim_head)                                # per (h, d)
    rh = r.reshape(heads, dim_head)
    context = (ctx_pix + ctxmem_ref[...] * ms[:, None, :]) * (rh[:, None, :] * scale)

    # ---- apply: out[h,e,n] = sum_d context[h,e,d] * q[h,d,n] (bf16 operands) --
    out = jnp.einsum('hed,hdn->hen',
                     context.astype(jnp.bfloat16), q.astype(jnp.bfloat16),
                     preferred_element_type=jnp.float32)                   # (h, e, N) f32
    out = out.reshape(hidden, N)

    # ---- to_out 1x1 conv + bias (bf16 operands, f32 accumulation) -------------
    y = jnp.dot(wout_ref[...], out.astype(jnp.bfloat16),
                preferred_element_type=jnp.float32) + bout_ref[...]        # (C, N) f32

    # ---- output RMSNorm over channels, f32 -------------------------------------
    ssq2 = jnp.sum(y * y, axis=0, keepdims=True)
    y = y * lax.rsqrt(jnp.maximum(ssq2, eps * eps)) * g2_ref[...]

    o_ref[0] = y.astype(o_ref.dtype)                                       # lane-dense store


def linear_attention_forward(x_nchw, gamma_in, w_qkv, mem_kv, w_out, b_out,
                             gamma_out, *, heads, dim_head):
    """Forward pass of `LinearAttention`.

    x_nchw   : (B, C, H, W)              f32 (PyTorch layout)
    gamma_in : (C,)                      RMSNorm gamma of self.norm
    w_qkv    : (3*heads*dim_head, C)     1x1 conv weight, no bias
    mem_kv   : (2, heads, dim_head, M)   learned memory kv
    w_out    : (C, heads*dim_head)       to_out conv weight
    b_out    : (C,)                      to_out conv bias
    gamma_out: (C,)                      RMSNorm gamma of to_out[1]
    returns  : (B, C, H, W)
    """
    B, C, H, W = x_nchw.shape
    N = H * W
    hidden = heads * dim_head
    scale = float(dim_head) ** -0.5

    # NCHW -> (B, C, H*W): pure contiguous reshape (no transpose, no pad).
    x = x_nchw.reshape(B, C, N).astype(jnp.float32)

    # Pre-folded affine constants; weights cast to bf16 (MXU-native).
    g1 = ((gamma_in.astype(jnp.float32) + 1.0) * (float(C) ** 0.5)).reshape(C, 1)
    g2 = ((gamma_out.astype(jnp.float32) + 1.0) * (float(C) ** 0.5)).reshape(C, 1)
    wqkv = w_qkv.astype(jnp.bfloat16)                                # (3*hidden, C)
    wout = w_out.astype(jnp.bfloat16)                                # (C, hidden)
    bout = b_out.astype(jnp.float32).reshape(C, 1)

    # Memory-kv contribution precomputed once (parameter-only work stays out of
    # the per-batch loop): running max, denominator part, and f32 context part.
    mk = mem_kv[0].astype(jnp.float32)                               # (h, d, M)
    mv = mem_kv[1].astype(jnp.float32)                               # (h, e, M)
    mk_max = jnp.max(mk, axis=-1)                                    # (h, d)
    emk = jnp.exp(mk - mk_max[..., None])                            # (h, d, M)
    s_mem = jnp.sum(emk, axis=-1)                                    # (h, d)
    ctx_mem = jnp.einsum('hem,hdm->hed', mv, emk)                    # (h, e, d)
    mk_max_col = mk_max.reshape(hidden, 1)
    s_mem_col = s_mem.reshape(hidden, 1)

    # Scoped-VMEM limit sized from the per-step footprint (>= default 32 MiB,
    # capped at 48 MiB to leave headroom on v7x's 64 MiB physical VMEM).
    est = (2 * 2 * C * N * 4                                   # x + out blocks, double-buffered
           + 2 * (3 * hidden * C + C * hidden) * 2             # bf16 weights (double-buffered)
           + 2 * (3 * C + 2 * hidden + heads * dim_head * dim_head) * 4
           + 8 * hidden * N * 4)                               # live qkv / ek / out intermediates
    vmem_limit = int(min(48 * 2 ** 20, max(32 * 2 ** 20, 2 * est)))

    kernel = partial(_linear_attention_kernel, heads=heads, dim_head=dim_head,
                     scale=scale, eps=1e-12)

    out = pl.pallas_call(
        kernel,
        out_shape=jax.ShapeDtypeStruct((B, C, N), jnp.float32),
        grid_spec=pltpu.PrefetchScalarGridSpec(
            num_scalar_prefetch=0,
            grid=(B,),
            in_specs=[
                pl.BlockSpec((1, C, N), lambda b: (b, 0, 0)),
                pl.BlockSpec((3 * hidden, C), lambda b: (0, 0)),
                pl.BlockSpec((C, hidden), lambda b: (0, 0)),
                pl.BlockSpec((C, 1), lambda b: (0, 0)),
                pl.BlockSpec((C, 1), lambda b: (0, 0)),
                pl.BlockSpec((C, 1), lambda b: (0, 0)),
                pl.BlockSpec((hidden, 1), lambda b: (0, 0)),
                pl.BlockSpec((hidden, 1), lambda b: (0, 0)),
                pl.BlockSpec((heads, dim_head, dim_head), lambda b: (0, 0, 0)),
            ],
            out_specs=pl.BlockSpec((1, C, N), lambda b: (b, 0, 0)),
        ),
        compiler_params=pltpu.CompilerParams(
            dimension_semantics=("parallel",),
            vmem_limit_bytes=vmem_limit),
    )(x, wqkv, wout, bout, g1, g2, mk_max_col, s_mem_col, ctx_mem)

    return out.reshape(B, C, H, W)


def _reference(x, gamma_in, w_qkv, mem_kv, w_out, b_out, gamma_out,
               *, heads, dim_head, mm_dtype=jnp.float32):
    """Pure-JAX reference mirroring the PyTorch module semantics.

    `mm_dtype` casts matmul operands (f32 for the exact module; bf16 to match
    the kernel's MXU operand precision)."""
    B, C, H, W = x.shape
    N = H * W
    hidden = heads * dim_head
    num_mem = mem_kv.shape[-1]
    scale = float(dim_head) ** -0.5
    eps = 1e-12

    def mm(t):
        return t.astype(mm_dtype)

    def rms_norm(t, gamma):
        norm = jnp.sqrt(jnp.sum(t * t, axis=1, keepdims=True))
        return (t / jnp.maximum(norm, eps)
                * (gamma[None, :, None, None] + 1.0) * (float(C) ** 0.5))

    xn = rms_norm(x, gamma_in)
    qkv = jnp.einsum('oc,bchw->bohw', mm(w_qkv), mm(xn),
                     preferred_element_type=jnp.float32)
    q, k, v = jnp.split(qkv, 3, axis=1)
    q = q.reshape(B, heads, dim_head, N)
    k = k.reshape(B, heads, dim_head, N)
    v = v.reshape(B, heads, dim_head, N)
    mk = jnp.broadcast_to(mem_kv[0][None], (B, heads, dim_head, num_mem))
    mv = jnp.broadcast_to(mem_kv[1][None], (B, heads, dim_head, num_mem))
    k = jnp.concatenate([mk, k], axis=-1)
    v = jnp.concatenate([mv, v], axis=-1)
    q = jax.nn.softmax(q, axis=-2) * scale
    k = jax.nn.softmax(k, axis=-1)
    context = jnp.einsum('bhdn,bhen->bhde', mm(k), mm(v),
                         preferred_element_type=jnp.float32)
    out = jnp.einsum('bhde,bhdn->bhen', mm(context), mm(q),
                     preferred_element_type=jnp.float32)
    out = out.reshape(B, hidden, H, W)
    y = jnp.einsum('oc,bchw->bohw', mm(w_out), mm(out),
                   preferred_element_type=jnp.float32)
    y = y + b_out[None, :, None, None]
    return rms_norm(y, gamma_out)


if __name__ == "__main__":
    # Small shapes consistent with the module: dim=4, heads=4, dim_head=32.
    B, C, H, W = 2, 4, 16, 16
    heads, dim_head, num_mem = 4, 32, 4
    hidden = heads * dim_head

    key = jax.random.PRNGKey(0)
    k_x, k_mem, k_wq, k_wo, k_bo = jax.random.split(key, 5)

    x = jax.random.normal(k_x, (B, C, H, W), jnp.float32)

    # Parameter init mirroring the PyTorch module's __init__:
    gamma_in = jnp.zeros((C,), jnp.float32)                    # RMSNorm gamma = 0
    gamma_out = jnp.zeros((C,), jnp.float32)
    mem_kv = jax.random.normal(k_mem, (2, heads, dim_head, num_mem), jnp.float32)
    bnd_qkv = 1.0 / (C ** 0.5)                                 # Conv2d(C, 3*hidden, 1)
    w_qkv = jax.random.uniform(k_wq, (3 * hidden, C), jnp.float32,
                               -bnd_qkv, bnd_qkv)
    bnd_out = 1.0 / (hidden ** 0.5)                            # Conv2d(hidden, C, 1)
    w_out = jax.random.uniform(k_wo, (C, hidden), jnp.float32, -bnd_out, bnd_out)
    b_out = jax.random.uniform(k_bo, (C,), jnp.float32, -bnd_out, bnd_out)

    out = jax.block_until_ready(
        linear_attention_forward(x, gamma_in, w_qkv, mem_kv, w_out, b_out,
                                 gamma_out, heads=heads, dim_head=dim_head))
    assert out.shape == (B, C, H, W)

    # 1) Exact f32 module reference: tolerance relaxed only because the
    #    kernel's MXU operands are bf16 (per the perf review); the kernel's
    #    joint-softmax / folded-normalizer algebra is exact.
    ref_f32 = _reference(x, gamma_in, w_qkv, mem_kv, w_out, b_out, gamma_out,
                         heads=heads, dim_head=dim_head, mm_dtype=jnp.float32)
    np.testing.assert_allclose(np.asarray(out), np.asarray(ref_f32),
                               rtol=5e-2, atol=5e-2)

    # 2) Reference with the same bf16 matmul-operand precision as the kernel:
    #    tight check of the kernel's algebra / layout.
    ref_bf16 = _reference(x, gamma_in, w_qkv, mem_kv, w_out, b_out, gamma_out,
                          heads=heads, dim_head=dim_head, mm_dtype=jnp.bfloat16)
    np.testing.assert_allclose(np.asarray(out), np.asarray(ref_bf16),
                               rtol=1e-2, atol=1e-2)

    print("KERNEL_OK")
</pallas_src>

<mosaic_0001>
module attributes {stable_mosaic.version = 11 : i64} {
  func.func @_linear_attention_kernel(%arg0: i32, %arg1: memref<1x4x256xf32, #tpu.memory_space<vmem>>, %arg2: memref<384x4xbf16, #tpu.memory_space<vmem>>, %arg3: memref<4x128xbf16, #tpu.memory_space<vmem>>, %arg4: memref<4x1xf32, #tpu.memory_space<vmem>>, %arg5: memref<4x1xf32, #tpu.memory_space<vmem>>, %arg6: memref<4x1xf32, #tpu.memory_space<vmem>>, %arg7: memref<128x1xf32, #tpu.memory_space<vmem>>, %arg8: memref<128x1xf32, #tpu.memory_space<vmem>>, %arg9: memref<4x32x32xf32, #tpu.memory_space<vmem>>, %arg10: memref<1x4x256xf32, #tpu.memory_space<vmem>>) attributes {dimension_semantics = [#tpu.dimension_semantics<parallel>], iteration_bounds = array<i64: 2>, scalar_prefetch = 0 : i64, scratch_operands = 0 : i64, tpu.core_type = #tpu.core_type<tc>, window_params = [{transform_indices = @transform_0, window_bounds = array<i64: 1, 4, 256>}, {pipeline_mode = #tpu.pipeline_mode<synchronous>, transform_indices = @transform_1, window_bounds = array<i64: 384, 4>}, {pipeline_mode = #tpu.pipeline_mode<synchronous>, transform_indices = @transform_2, window_bounds = array<i64: 4, 128>}, {pipeline_mode = #tpu.pipeline_mode<synchronous>, transform_indices = @transform_3, window_bounds = array<i64: 4, 1>}, {pipeline_mode = #tpu.pipeline_mode<synchronous>, transform_indices = @transform_4, window_bounds = array<i64: 4, 1>}, {pipeline_mode = #tpu.pipeline_mode<synchronous>, transform_indices = @transform_5, window_bounds = array<i64: 4, 1>}, {pipeline_mode = #tpu.pipeline_mode<synchronous>, transform_indices = @transform_6, window_bounds = array<i64: 128, 1>}, {pipeline_mode = #tpu.pipeline_mode<synchronous>, transform_indices = @transform_7, window_bounds = array<i64: 128, 1>}, {pipeline_mode = #tpu.pipeline_mode<synchronous>, transform_indices = @transform_8, window_bounds = array<i64: 4, 32, 32>}, {transform_indices = @transform_9, window_bounds = array<i64: 1, 4, 256>}]} {
    %c0 = arith.constant 0 : index
    %c0_0 = arith.constant 0 : index
    %c0_1 = arith.constant 0 : index
    %0 = vector.load %arg1[%c0, %c0_0, %c0_1] : memref<1x4x256xf32, #tpu.memory_space<vmem>>, vector<1x4x256xf32>
    %1 = vector.shape_cast %0 : vector<1x4x256xf32> to vector<4x256xf32>
    %2 = arith.mulf %1, %1 : vector<4x256xf32>
    %cst = arith.constant dense<0.000000e+00> : vector<256xf32>
    %3 = vector.multi_reduction <add>, %2, %cst [0] : vector<4x256xf32> to vector<256xf32>
    %4 = vector.shape_cast %3 : vector<256xf32> to vector<1x256xf32>
    %cst_2 = arith.constant 1.000000e-24 : f32
    %5 = vector.broadcast %cst_2 : f32 to vector<1x256xf32>
    %6 = arith.maximumf %4, %5 : vector<1x256xf32>
    %7 = math.rsqrt %6 : vector<1x256xf32>
    %8 = vector.broadcast %7 : vector<1x256xf32> to vector<4x256xf32>
    %9 = arith.mulf %1, %8 : vector<4x256xf32>
    %c0_3 = arith.constant 0 : index
    %c0_4 = arith.constant 0 : index
    %10 = vector.load %arg5[%c0_3, %c0_4] : memref<4x1xf32, #tpu.memory_space<vmem>>, vector<4x1xf32>
    %11 = vector.broadcast %10 : vector<4x1xf32> to vector<4x256xf32>
    %12 = arith.mulf %9, %11 : vector<4x256xf32>
    %c0_5 = arith.constant 0 : index
    %c0_6 = arith.constant 0 : index
    %13 = vector.load %arg2[%c0_5, %c0_6] : memref<384x4xbf16, #tpu.memory_space<vmem>>, vector<384x4xbf16>
    %14 = arith.truncf %12 : vector<4x256xf32> to vector<4x256xbf16>
    %cst_7 = arith.constant dense<0.000000e+00> : vector<384x256xf32>
    %15 = tpu.matmul %13, %14, %cst_7 {dimension_numbers = #tpu.dot_dimension_numbers<[1], [0], [0], [1], [0, 0, 1, 1], [], []>} : vector<384x4xbf16>, vector<4x256xbf16>, vector<384x256xf32> -> vector<384x256xf32>
    %16 = vector.extract_strided_slice %15 {offsets = [0, 0], sizes = [128, 256], strides = [1, 1]} : vector<384x256xf32> to vector<128x256xf32>
    %17 = vector.shape_cast %16 : vector<128x256xf32> to vector<4x32x256xf32>
    %18 = vector.extract_strided_slice %15 {offsets = [128, 0], sizes = [128, 256], strides = [1, 1]} : vector<384x256xf32> to vector<128x256xf32>
    %19 = vector.extract_strided_slice %15 {offsets = [256, 0], sizes = [128, 256], strides = [1, 1]} : vector<384x256xf32> to vector<128x256xf32>
    %cst_8 = arith.constant dense<0xFF800000> : vector<4x256xf32>
    %20 = vector.multi_reduction <maximumf>, %17, %cst_8 [1] : vector<4x32x256xf32> to vector<4x256xf32>
    %21 = vector.shape_cast %20 : vector<4x256xf32> to vector<4x1x256xf32>
    %22 = vector.broadcast %21 : vector<4x1x256xf32> to vector<4x32x256xf32>
    %23 = arith.subf %17, %22 : vector<4x32x256xf32>
    %24 = math.exp %23 : vector<4x32x256xf32>
    %cst_9 = arith.constant dense<0.000000e+00> : vector<4x256xf32>
    %25 = vector.multi_reduction <add>, %24, %cst_9 [1] : vector<4x32x256xf32> to vector<4x256xf32>
    %26 = vector.shape_cast %25 : vector<4x256xf32> to vector<4x1x256xf32>
    %27 = tpu.reciprocal %26 {approx = true} : vector<4x1x256xf32> -> vector<4x1x256xf32>
    %28 = vector.broadcast %27 : vector<4x1x256xf32> to vector<4x32x256xf32>
    %29 = arith.mulf %24, %28 : vector<4x32x256xf32>
    %cst_10 = arith.constant dense<0xFF800000> : vector<128xf32>
    %30 = vector.multi_reduction <maximumf>, %18, %cst_10 [1] : vector<128x256xf32> to vector<128xf32>
    %31 = vector.shape_cast %30 : vector<128xf32> to vector<128x1xf32>
    %c0_11 = arith.constant 0 : index
    %c0_12 = arith.constant 0 : index
    %32 = vector.load %arg7[%c0_11, %c0_12] : memref<128x1xf32, #tpu.memory_space<vmem>>, vector<128x1xf32>
    %33 = arith.maximumf %31, %32 : vector<128x1xf32>
    %34 = vector.broadcast %33 : vector<128x1xf32> to vector<128x256xf32>
    %35 = arith.subf %18, %34 : vector<128x256xf32>
    %36 = math.exp %35 : vector<128x256xf32>
    %c0_13 = arith.constant 0 : index
    %c0_14 = arith.constant 0 : index
    %37 = vector.load %arg7[%c0_13, %c0_14] : memref<128x1xf32, #tpu.memory_space<vmem>>, vector<128x1xf32>
    %38 = arith.subf %37, %33 : vector<128x1xf32>
    %39 = math.exp %38 : vector<128x1xf32>
    %cst_15 = arith.constant dense<0.000000e+00> : vector<128xf32>
    %40 = vector.multi_reduction <add>, %36, %cst_15 [1] : vector<128x256xf32> to vector<128xf32>
    %41 = vector.shape_cast %40 : vector<128xf32> to vector<128x1xf32>
    %c0_16 = arith.constant 0 : index
    %c0_17 = arith.constant 0 : index
    %42 = vector.load %arg8[%c0_16, %c0_17] : memref<128x1xf32, #tpu.memory_space<vmem>>, vector<128x1xf32>
    %43 = arith.mulf %42, %39 : vector<128x1xf32>
    %44 = arith.addf %41, %43 : vector<128x1xf32>
    %45 = tpu.reciprocal %44 {approx = true} : vector<128x1xf32> -> vector<128x1xf32>
    %46 = arith.truncf %19 : vector<128x256xf32> to vector<128x256xbf16>
    %47 = arith.truncf %36 : vector<128x256xf32> to vector<128x256xbf16>
    %cst_18 = arith.constant dense<0.000000e+00> : vector<128x128xf32>
    %48 = tpu.matmul %46, %47, %cst_18 {dimension_numbers = #tpu.dot_dimension_numbers<[1], [1], [0], [0], [0, 0, 1, 0], [], []>} : vector<128x256xbf16>, vector<128x256xbf16>, vector<128x128xf32> -> vector<128x128xf32>
    %49 = vector.extract_strided_slice %48 {offsets = [0, 0], sizes = [32, 32], strides = [1, 1]} : vector<128x128xf32> to vector<32x32xf32>
    %50 = vector.extract_strided_slice %48 {offsets = [32, 32], sizes = [32, 32], strides = [1, 1]} : vector<128x128xf32> to vector<32x32xf32>
    %51 = vector.extract_strided_slice %48 {offsets = [64, 64], sizes = [32, 32], strides = [1, 1]} : vector<128x128xf32> to vector<32x32xf32>
    %52 = vector.extract_strided_slice %48 {offsets = [96, 96], sizes = [32, 32], strides = [1, 1]} : vector<128x128xf32> to vector<32x32xf32>
    %53 = vector.shape_cast %49 : vector<32x32xf32> to vector<1x32x32xf32>
    %54 = vector.shape_cast %50 : vector<32x32xf32> to vector<1x32x32xf32>
    %55 = vector.shape_cast %51 : vector<32x32xf32> to vector<1x32x32xf32>
    %56 = vector.shape_cast %52 : vector<32x32xf32> to vector<1x32x32xf32>
    %57 = tpu.concatenate %53, %54, %55, %56 in 0 : vector<1x32x32xf32>, vector<1x32x32xf32>, vector<1x32x32xf32>, vector<1x32x32xf32> -> vector<4x32x32xf32>
    %58 = vector.shape_cast %39 : vector<128x1xf32> to vector<4x32xf32>
    %59 = vector.shape_cast %45 : vector<128x1xf32> to vector<4x32xf32>
    %c0_19 = arith.constant 0 : index
    %c0_20 = arith.constant 0 : index
    %c0_21 = arith.constant 0 : index
    %60 = vector.load %arg9[%c0_19, %c0_20, %c0_21] : memref<4x32x32xf32, #tpu.memory_space<vmem>>, vector<4x32x32xf32>
    %61 = vector.shape_cast %58 : vector<4x32xf32> to vector<4x1x32xf32>
    %62 = vector.broadcast %61 : vector<4x1x32xf32> to vector<4x32x32xf32>
    %63 = arith.mulf %60, %62 : vector<4x32x32xf32>
    %64 = arith.addf %57, %63 : vector<4x32x32xf32>
    %65 = vector.shape_cast %59 : vector<4x32xf32> to vector<4x1x32xf32>
    %cst_22 = arith.constant 0.176776692 : f32
    %66 = vector.broadcast %cst_22 : f32 to vector<4x1x32xf32>
    %67 = arith.mulf %65, %66 : vector<4x1x32xf32>
    %68 = vector.broadcast %67 : vector<4x1x32xf32> to vector<4x32x32xf32>
    %69 = arith.mulf %64, %68 : vector<4x32x32xf32>
    %70 = arith.truncf %69 : vector<4x32x32xf32> to vector<4x32x32xbf16>
    %71 = arith.truncf %29 : vector<4x32x256xf32> to vector<4x32x256xbf16>
    "tpu.trace_start"() <{level = 10 : i32, message = "hed,hdn->hen"}> : () -> ()
    %cst_23 = arith.constant dense<0.000000e+00> : vector<4x32x256xf32>
    %72 = tpu.matmul %70, %71, %cst_23 {dimension_numbers = #tpu.dot_dimension_numbers<[2], [1], [1], [2], [0, 0, 0, 1, 1, 2], [0], [0]>} : vector<4x32x32xbf16>, vector<4x32x256xbf16>, vector<4x32x256xf32> -> vector<4x32x256xf32>
    "tpu.trace_stop"() : () -> ()
    %73 = vector.shape_cast %72 : vector<4x32x256xf32> to vector<128x256xf32>
    %c0_24 = arith.constant 0 : index
    %c0_25 = arith.constant 0 : index
    %74 = vector.load %arg3[%c0_24, %c0_25] : memref<4x128xbf16, #tpu.memory_space<vmem>>, vector<4x128xbf16>
    %75 = arith.truncf %73 : vector<128x256xf32> to vector<128x256xbf16>
    %cst_26 = arith.constant dense<0.000000e+00> : vector<4x256xf32>
    %76 = tpu.matmul %74, %75, %cst_26 {dimension_numbers = #tpu.dot_dimension_numbers<[1], [0], [0], [1], [0, 0, 1, 1], [], []>} : vector<4x128xbf16>, vector<128x256xbf16>, vector<4x256xf32> -> vector<4x256xf32>
    %c0_27 = arith.constant 0 : index
    %c0_28 = arith.constant 0 : index
    %77 = vector.load %arg4[%c0_27, %c0_28] : memref<4x1xf32, #tpu.memory_space<vmem>>, vector<4x1xf32>
    %78 = vector.broadcast %77 : vector<4x1xf32> to vector<4x256xf32>
    %79 = arith.addf %76, %78 : vector<4x256xf32>
    %80 = arith.mulf %79, %79 : vector<4x256xf32>
    %cst_29 = arith.constant dense<0.000000e+00> : vector<256xf32>
    %81 = vector.multi_reduction <add>, %80, %cst_29 [0] : vector<4x256xf32> to vector<256xf32>
    %82 = vector.shape_cast %81 : vector<256xf32> to vector<1x256xf32>
    %cst_30 = arith.constant 1.000000e-24 : f32
    %83 = vector.broadcast %cst_30 : f32 to vector<1x256xf32>
    %84 = arith.maximumf %82, %83 : vector<1x256xf32>
    %85 = math.rsqrt %84 : vector<1x256xf32>
    %86 = vector.broadcast %85 : vector<1x256xf32> to vector<4x256xf32>
    %87 = arith.mulf %79, %86 : vector<4x256xf32>
    %c0_31 = arith.constant 0 : index
    %c0_32 = arith.constant 0 : index
    %88 = vector.load %arg6[%c0_31, %c0_32] : memref<4x1xf32, #tpu.memory_space<vmem>>, vector<4x1xf32>
    %89 = vector.broadcast %88 : vector<4x1xf32> to vector<4x256xf32>
    %90 = arith.mulf %87, %89 : vector<4x256xf32>
    %c0_33 = arith.constant 0 : index
    %c0_34 = arith.constant 0 : index
    %c0_35 = arith.constant 0 : index
    %91 = vector.load %arg10[%c0_33, %c0_34, %c0_35] : memref<1x4x256xf32, #tpu.memory_space<vmem>>, vector<1x4x256xf32>
    %92 = vector.shape_cast %91 : vector<1x4x256xf32> to vector<4x256xf32>
    %93 = vector.shape_cast %90 : vector<4x256xf32> to vector<1x4x256xf32>
    tpu.vector_store %arg10[%c0_33, %c0_34, %c0_35], %93 {strides = array<i32>} : memref<1x4x256xf32, #tpu.memory_space<vmem>>, vector<1x4x256xf32>,
    return
  }
  func.func @transform_0(%arg0: i32) -> (i32, i32, i32) {
    %c0_i32 = arith.constant 0 : i32
    %c0_i32_0 = arith.constant 0 : i32
    %c0_i32_1 = arith.constant 0 : i32
    return %arg0, %c0_i32, %c0_i32_0 : i32, i32, i32
  }
  func.func @transform_1(%arg0: i32) -> (i32, i32) {
    %c0_i32 = arith.constant 0 : i32
    %c0_i32_0 = arith.constant 0 : i32
    %c0_i32_1 = arith.constant 0 : i32
    return %c0_i32, %c0_i32_0 : i32, i32
  }
  func.func @transform_2(%arg0: i32) -> (i32, i32) {
    %c0_i32 = arith.constant 0 : i32
    %c0_i32_0 = arith.constant 0 : i32
    %c0_i32_1 = arith.constant 0 : i32
    return %c0_i32, %c0_i32_0 : i32, i32
  }
  func.func @transform_3(%arg0: i32) -> (i32, i32) {
    %c0_i32 = arith.constant 0 : i32
    %c0_i32_0 = arith.constant 0 : i32
    %c0_i32_1 = arith.constant 0 : i32
    return %c0_i32, %c0_i32_0 : i32, i32
  }
  func.func @transform_4(%arg0: i32) -> (i32, i32) {
    %c0_i32 = arith.constant 0 : i32
    %c0_i32_0 = arith.constant 0 : i32
    %c0_i32_1 = arith.constant 0 : i32
    return %c0_i32, %c0_i32_0 : i32, i32
  }
  func.func @transform_5(%arg0: i32) -> (i32, i32) {
    %c0_i32 = arith.constant 0 : i32
    %c0_i32_0 = arith.constant 0 : i32
    %c0_i32_1 = arith.constant 0 : i32
    return %c0_i32, %c0_i32_0 : i32, i32
  }
  func.func @transform_6(%arg0: i32) -> (i32, i32) {
    %c0_i32 = arith.constant 0 : i32
    %c0_i32_0 = arith.constant 0 : i32
    %c0_i32_1 = arith.constant 0 : i32
    return %c0_i32, %c0_i32_0 : i32, i32
  }
  func.func @transform_7(%arg0: i32) -> (i32, i32) {
    %c0_i32 = arith.constant 0 : i32
    %c0_i32_0 = arith.constant 0 : i32
    %c0_i32_1 = arith.constant 0 : i32
    return %c0_i32, %c0_i32_0 : i32, i32
  }
  func.func @transform_8(%arg0: i32) -> (i32, i32, i32) {
    %c0_i32 = arith.constant 0 : i32
    %c0_i32_0 = arith.constant 0 : i32
    %c0_i32_1 = arith.constant 0 : i32
    %c0_i32_2 = arith.constant 0 : i32
    return %c0_i32, %c0_i32_0, %c0_i32_1 : i32, i32, i32
  }
  func.func @transform_9(%arg0: i32) -> (i32, i32, i32) {
    %c0_i32 = arith.constant 0 : i32
    %c0_i32_0 = arith.constant 0 : i32
    %c0_i32_1 = arith.constant 0 : i32
    return %arg0, %c0_i32, %c0_i32_0 : i32, i32, i32
  }
}

</mosaic_0001>

<bundles_post_ra>
// kernel: tpu_custom_call.1
= control target key start
LH: loop header
LB: loop body
LE: loop exit
PB: predicated region body
PF: predicated region fallthrough
CT: control target
= control target key end

     0   :  { %14 = vsyncpa [#allocation3], 0  ;;  %s4337_s0 = inlined_call_operand.vmem [shape: f32[2,4,256], index: 0, kind: input, shape index: {}]   ;;  %s4338_s1 = inlined_call_operand.vmem [shape: bf16[384,4], index: 1, kind: input, shape index: {}]   ;;  %s4339_s2 = inlined_call_operand.vmem [shape: bf16[4,128], index: 2, kind: input, shape index: {}]   ;;  %s4340_s3 = inlined_call_operand.vmem [shape: f32[4,1], index: 3, kind: input, shape index: {}]   ;;  %s4341_s4 = inlined_call_operand.vmem [shape: f32[4,1], index: 4, kind: input, shape index: {}]   ;;  %s4342_s5 = inlined_call_operand.vmem [shape: f32[4,1], index: 5, kind: input, shape index: {}]   ;;  %s4343_s6 = inlined_call_operand.vmem [shape: f32[128,1], index: 6, kind: input, shape index: {}]   ;;  %s4344_s7 = inlined_call_operand.vmem [shape: f32[128,1], index: 7, kind: input, shape index: {}]   ;;  %s4345_s8 = inlined_call_operand.vmem [shape: f32[4,32,32], index: 8, kind: input, shape index: {}]   ;;  %s4346_s9 = inlined_call_operand.hbm [shape: f32[2,4,256], index: 9, kind: output, shape index: {}]  }
   0x1   :  { %16 = vsyncpa [#allocation3 + $0x1], 0  ;;  %s3204_s30 = smov 0   ;;  %s3206_s10 = smov 0  }
   0x2   :  { %s3208_s11 = smov 0   ;;  %s3210_s12 = smov 0  }
   0x3 LB: > { %s3225_s13 = sadd.s32 4294967295, %s3147_s12   ;;  %s2624_s14 = sadd.s32 4294967294, %s3147_s12   ;;  %s3147_s12 = sphi %s3210_s12, %s4436_s12   ;;  %s3143_s11 = sphi %s3208_s11, %s4435_s11   ;;  %s3139_s10 = sphi %s3206_s10, %s4434_s10   ;;  %s3135_s30 = sphi %s3204_s30, %s4433_s30  }
   0x4   : > { %s3229_s15 = sadd.s32 1, %s3147_s12   ;;  %s223_s16 = sadd.s32 1, %s3143_s11 }
   0x5   : > { %s220_s17 = ssub.s32 %s3147_s12, %s3229_s15  ;;  %p233_p0 = scmp.ne.s32.totalorder %s3143_s11, %s3139_s10 }
   0x6   : > { %p221_p1 = scmp.eq.s32.totalorder %s220_s17, 0  ;;  %p234_p2 = scmp.eq.s32.totalorder %s3225_s13, 1 }
   0x7   : > { %p239_p3 = scmp.ne.s32.totalorder %s3139_s10, %s3135_s30  ;;  %p240_p4 = scmp.eq.s32.totalorder %s2624_s14, 1 }
   0x8   : > { %s3240_s18 = scalar_select %p221_p1, %s3143_s11, %s223_s16  }
   0x9   : > { %p3242_p5 = por %p234_p2, %p233_p0  ;;  %p3246_p6 = por %p240_p4, %p239_p3 }
   0xa   : > { %p2627_p7 = scmp.ge.s32.totalorder %s3147_s12, 1  ;;  %p290_p8 = scmp.lt.s32.totalorder %s3147_s12, 3 }
   0xc   : > { %p291_p9 = pnand %p2627_p7, %p290_p8 }
   0xe   : > { %294 = sbr.rel (%p291_p9) target bundleno = 1745 (0x6d1), region = 56 }
  0x13   : > { %v383_v0 = vld [vmem:[%s4341_s4] sm:$0xf]  ;;  %v3149_v1 = vmov 0   ;;  %p326_p10 = scmp.lt.s32.totalorder %s3225_s13, 1  ;;  %vm340_vm0 = vcmask 1043456   ;;  %vm643_vm7 = vcmask 1041408  }
  0x14   : > { %2866 = vset.pattern.permute.xlu0 %v3149_v1  ;;  %2867 = vset.pattern.permute.xlu2 %v3149_v1  ;;  %v3150_v36 = vmov 839922192   ;;  %v2797_v51 = vld [vmem:[%s4338_s1] sm:$0xff]  ;;  %vm570_vm8 = vcmask 31744   ;;  %v2798_v52 = vld [vmem:[%s4338_s1 + $0x8] sm:$0xff]  ;;  %v2799_v53 = vld [vmem:[%s4338_s1 + $0x10] sm:$0xff] }
  0x15   : > { %386 = vperm.xlu0 %2866, %v383_v0   ;;  %2868 = vset.pattern.permute.xlu1 %v3149_v1  ;;  %s327_s23 = scalar_select %p326_p10, %s3225_s13, 1  ;;  %v389_v37 = vunpack.c.l.s4 %v3150_v36  ;;  %v2800_v54 = vld [vmem:[%s4338_s1 + $0x18] sm:$0xff]  ;;  %v2801_v55 = vld [vmem:[%s4338_s1 + $0x20] sm:$0xff]  ;;  %v2802_v56 = vld [vmem:[%s4338_s1 + $0x28] sm:$0xff]  ;;  %vm1867_vm9 = vcmask 130112   ;;  %vm1871_vm10 = vcmask 195712  }
  0x16   : > { %v2803_v57 = vld [vmem:[%s4338_s1 + $0x30] sm:$0xff]  ;;  %v2804_v58 = vld [vmem:[%s4338_s1 + $0x38] sm:$0xff]  ;;  %v2805_v59 = vld [vmem:[%s4338_s1 + $0x40] sm:$0xff]  ;;  %vm1875_vm11 = vcmask 261312   ;;  %s3151_s22 = smov 96   ;;  %s3152_s25 = smov 64  }
  0x17   : > { %s2796_s24 = sshll.u32 %s327_s23, 3  ;;  %v390_v40 = vunpack.c.0.s8 %v389_v37  ;;  %vm2178_vm12 = vcmask 261120   ;;  %s3153_s28 = smov 32  }
  0x18   : > { %s330_s27 = scalar_lea.vmem %s4337_s0, %s2796_s24  ;;  %s323_s26 = sand.u32 1, %s3139_s10  }
  0x19   : > { %v332_v2 = vld [vmem:[%s330_s27] sm:$0xff]  ;;  %s2821_s27 = sshll.u32 %s3225_s13, 3  ;;  %s2549_s13 = scalar_lea.sflag [#allocation3], %s323_s26 }
  0x1a   : > { %v333_v3 = vmul.f32 %v332_v2, %v332_v2  ;;  %s2560_s14 = scalar_lea.hbm %s4346_s9, %s2821_s27 }
  0x1b   : > { %s2564_s21 = sshll.u32 %s2560_s14, 4  ;;  %s2565_s21 = int_to_ptr.hbm [resolvable:$true] %s2564_s21 }
  0x1c   : > { %335 = vst [vmem:[#allocation1] ss:$2 sm:$0xff] %v333_v3  ;;  %s3099_s23 = sshra.s32 %s2565_s21, 4  ;;  %s3100_s23 = int_to_ptr.hbm [resolvable:$true] %s3099_s23 }
  0x1d   : > { %s3101_s24 = scalar_lea.hbm %s3100_s23, 8  ;;  %p3106_p0 = scmp.lt.s32.totalorder %s3100_s23, %s4346_s9 }
  0x1e   : > { %p3102_p11 = scmp.ne.s32.totalorder %s3100_s23, %s3101_s24 }
  0x20   : > { %p3103_p12 = pnand %p3102_p11, %p3242_p5 }
  0x22   : > { %p3104_p13 = pneg %p3103_p12 }
  0x23   : > { %v337_v4 = vld.sshfl [vmem:[#allocation1 + $0x8] sm:$0xff pattern:$0x75316420]  ;;  %v336_v6 = vld.sshfl [vmem:[#allocation1] sm:$0xff pattern:$0x75316420] }
  0x24   : > { %v348_v5 = vsel %vm340_vm0, %v337_v4, 0.0  ;;  %v341_v8 = vsel %vm340_vm0, %v336_v6, 0.0 }
  0x25   : > { %v349_v7 = vrot.slane %v348_v5, 4  ;;  %v342_v9 = vrot.slane %v341_v8, 4 }
  0x27   : > { %v350_v10 = vadd.f32 %v349_v7, %v348_v5  ;;  %v343_v11 = vadd.f32 %v342_v9, %v341_v8 }
  0x29   : > { %v351_v12 = vrot.slane %v350_v10, 2  ;;  %v344_v13 = vrot.slane %v343_v11, 2 }
  0x2b   : > { %v352_v14 = vadd.f32 %v351_v12, %v350_v10  ;;  %v345_v15 = vadd.f32 %v344_v13, %v343_v11 }
  0x2d   : > { %v353_v16 = vrot.slane %v352_v14, 1  ;;  %v346_v17 = vrot.slane %v345_v15, 1 }
  0x2f   : > { %v354_v18 = vadd.f32 %v353_v16, %v352_v14  ;;  %v347_v19 = vadd.f32 %v346_v17, %v345_v15  ;;  %v2807_v17 = vld [vmem:[%s4338_s1 + $0x50] sm:$0xff] }
  0x31   : > { %v356_v20 = vmax.f32 %v354_v18, 1e-24  ;;  %v355_v21 = vmax.f32 %v347_v19, 1e-24 }
  0x33   : > { %2869 = vrsqrt.f32 %v356_v20  ;;  %vm373_vm1 = vweird.f32 %v356_v20  ;;  %vm363_vm4 = vweird.f32 %v355_v21 }
  0x34   : > { %2871 = vrsqrt.f32 %v355_v21 }
  0x39   : > { %v2870_v22 = vpop.eup %2869 }
  0x3a   : > { %v368_v23 = vmul.f32 %v2870_v22, %v356_v20  ;;  %v2872_v24 = vpop.eup %2871  ;;  %vm374_vm2 = vweird.f32 %v2870_v22 }
  0x3b   : > { %v358_v25 = vmul.f32 %v2872_v24, %v355_v21  ;;  %vm375_vm3 = vmor %vm373_vm1, %vm374_vm2  ;;  %vm364_vm5 = vweird.f32 %v2872_v24 }
  0x3c   : > { %v369_v26 = vmul.f32 %v2870_v22, %v368_v23  ;;  %vm365_vm6 = vmor %vm363_vm4, %vm364_vm5 }
  0x3d   : > { %v359_v27 = vmul.f32 %v2872_v24, %v358_v25 }
  0x3e   : > { %v370_v28 = vmul.f32 0.5, %v369_v26 }
  0x3f   : > { %v360_v29 = vmul.f32 0.5, %v359_v27 }
  0x40   : > { %v371_v30 = vsub.f32 1.5, %v370_v28 }
  0x41   : > { %v361_v31 = vsub.f32 1.5, %v360_v29 }
  0x42   : > { %v372_v32 = vmul.f32 %v2870_v22, %v371_v30 }
  0x43   : > { %v362_v33 = vmul.f32 %v2872_v24, %v361_v31 }
  0x44   : > { %v376_v34 = vsel %vm375_vm3, %v2870_v22, %v372_v32 }
  0x45   : > { %v379_v35 = vrot.slane %v376_v34, 4  ;;  %v366_v38 = vsel %vm365_vm6, %v2872_v24, %v362_v33 }
  0x47   : > { %v380_v39 = vsel %vm340_vm0, %v366_v38, %v379_v35 }
  0x48   : > { %v382_v41 = vmul.f32 %v380_v39, %v332_v2  ;;  %v2806_v2 = vld [vmem:[%s4338_s1 + $0x48] sm:$0xff] }
  0x87   : > { %v387_v42 = vpop.permute.xlu0 %386 }
  0x88   : > { %v391_v43 = vperm.slane %v387_v42, %v390_v40 }
  0x8a   : > { %v393_v44 = vmul.f32 %v391_v43, %v382_v41 }
  0x8c   : > { %443 = vst [vmem:[#allocation1] ss:$2 sm:$0xff] %v393_v44 }
  0x93   : > { %v444_v45 = vld.sshfl [vmem:[#allocation1] sm:$0xff pattern:$0x75316420]  ;;  %v445_v46 = vld.sshfl [vmem:[#allocation1 + $0x8] sm:$0xff pattern:$0x75316420] }
  0x94   : > { %v448_v47 = vpack.c.bf16 %v444_v45, %v444_v45  ;;  %v449_v48 = vpack.c.bf16 %v445_v46, %v445_v46  ;;  %v2808_v45 = vld [vmem:[%s4338_s1 + $0x58] sm:$0xff] }
  0x96   : > { %v645_v49 = vsel %vm643_vm7, %v448_v47, 0  ;;  %v648_v50 = vsel %vm643_vm7, %v449_v48, 0 }
  0x97   : > { %657 = vmatpush.bf16.msra.mxu0 %v645_v49  ;;  %786 = vmatpush.bf16.msra.mxu1 %v648_v50 }
  0x9a   : > { %2727 = vmatmul.msk.bf16.vlgmr.msra.gmra.mxu0 %vm570_vm8, %v2797_v51  ;;  %2751 = vmatmul.msk.bf16.vlgmr.msra.gmra.mxu1 %vm570_vm8, %v2797_v51 }
  0xaa   : > { %2728 = vmatmul.msk.bf16.gmra.mxu0 %vm570_vm8, %v2798_v52  ;;  %2752 = vmatmul.msk.bf16.gmra.mxu1 %vm570_vm8, %v2798_v52 }
  0xba   : > { %2729 = vmatmul.msk.bf16.gmra.mxu0 %vm570_vm8, %v2799_v53  ;;  %2753 = vmatmul.msk.bf16.gmra.mxu1 %vm570_vm8, %v2799_v53 }
  0xca   : > { %2730 = vmatmul.msk.bf16.gmra.mxu0 %vm570_vm8, %v2800_v54  ;;  %2754 = vmatmul.msk.bf16.gmra.mxu1 %vm570_vm8, %v2800_v54 }
  0xda   : > { %2731 = vmatmul.msk.bf16.gmra.mxu0 %vm570_vm8, %v2801_v55  ;;  %2755 = vmatmul.msk.bf16.gmra.mxu1 %vm570_vm8, %v2801_v55 }
  0xea   : > { %2732 = vmatmul.msk.bf16.gmra.mxu0 %vm570_vm8, %v2802_v56  ;;  %2756 = vmatmul.msk.bf16.gmra.mxu1 %vm570_vm8, %v2802_v56 }
  0xfa   : > { %2733 = vmatmul.msk.bf16.gmra.mxu0 %vm570_vm8, %v2803_v57  ;;  %2757 = vmatmul.msk.bf16.gmra.mxu1 %vm570_vm8, %v2803_v57 }
 0x10a   : > { %2734 = vmatmul.msk.bf16.gmra.mxu0 %vm570_vm8, %v2804_v58  ;;  %2758 = vmatmul.msk.bf16.gmra.mxu1 %vm570_vm8, %v2804_v58 }
 0x117   : > { %v659_v60 = vpop.f32.mrf.mxu0  ;;  %v788_v61 = vpop.f32.mrf.mxu1 }
 0x11a   : > { %2735 = vmatmul.msk.bf16.gmra.mxu0 %vm570_vm8, %v2805_v59  ;;  %2759 = vmatmul.msk.bf16.gmra.mxu1 %vm570_vm8, %v2805_v59 }
 0x11f   : > { %v661_v62 = vpop.f32.mrf.mxu0  ;;  %v790_v63 = vpop.f32.mrf.mxu1 }
 0x120   : > { %v908_v0 = vmax.f32 %v659_v60, %v661_v62  ;;  %v917_v1 = vmax.f32 %v788_v61, %v790_v63 }
 0x127   : > { %v664_v3 = vpop.f32.mrf.mxu0  ;;  %v793_v4 = vpop.f32.mrf.mxu1 }
 0x128   : > { %v909_v5 = vmax.f32 %v908_v0, %v664_v3  ;;  %v918_v6 = vmax.f32 %v917_v1, %v793_v4 }
 0x12a   : > { %2736 = vmatmul.msk.bf16.gmra.mxu0 %vm570_vm8, %v2806_v2  ;;  %2760 = vmatmul.msk.bf16.gmra.mxu1 %vm570_vm8, %v2806_v2 }
 0x12f   : > { %v666_v7 = vpop.f32.mrf.mxu0  ;;  %v795_v8 = vpop.f32.mrf.mxu1 }
 0x130   : > { %v910_v9 = vmax.f32 %v909_v5, %v666_v7  ;;  %v919_v10 = vmax.f32 %v918_v6, %v795_v8 }
 0x132   : > { %v911_v11 = vrot.slane %v910_v9, 4  ;;  %v920_v12 = vrot.slane %v919_v10, 4 }
 0x134   : > { %v912_v13 = vmax.f32 %v910_v9, %v911_v11  ;;  %v921_v14 = vmax.f32 %v919_v10, %v920_v12 }
 0x136   : > { %v913_v15 = vrot.slane %v912_v13, 2  ;;  %v922_v16 = vrot.slane %v921_v14, 2 }
 0x137   : > { %v3316_v18 = vpop.f32.mrf.mxu0  ;;  %v3318_v19 = vpop.f32.mrf.mxu1 }
 0x138   : > { %v914_v20 = vmax.f32 %v912_v13, %v913_v15  ;;  %v923_v21 = vmax.f32 %v921_v14, %v922_v16 }
 0x13a   : > { %v915_v22 = vrot.slane %v914_v20, 1  ;;  %v924_v23 = vrot.slane %v923_v21, 1  ;;  %2737 = vmatmul.msk.bf16.gmra.mxu0 %vm570_vm8, %v2807_v17  ;;  %2761 = vmatmul.msk.bf16.gmra.mxu1 %vm570_vm8, %v2807_v17  ;;  %v2809_v17 = vld [vmem:[%s4338_s1 + $0x60] sm:$0xff] }
 0x13c   : > { %v916_v24 = vmax.f32 %v914_v20, %v915_v22  ;;  %v925_v25 = vmax.f32 %v923_v21, %v924_v23 }
 0x13e   : > { %v980_v26 = vsub.f32 %v659_v60, %v916_v24  ;;  %v982_v27 = vsub.f32 %v661_v62, %v916_v24  ;;  %v984_v28 = vsub.f32 %v664_v3, %v916_v24  ;;  %v986_v29 = vsub.f32 %v666_v7, %v916_v24 }
 0x13f   : > { %v981_v30 = vsub.f32 %v788_v61, %v925_v25  ;;  %v983_v31 = vsub.f32 %v790_v63, %v925_v25  ;;  %v985_v32 = vsub.f32 %v793_v4, %v925_v25  ;;  %v987_v33 = vsub.f32 %v795_v8, %v925_v25  ;;  %v3322_v34 = vpop.f32.mrf.mxu0  ;;  %v3324_v35 = vpop.f32.mrf.mxu1 }
 0x140   : > { %v1012_v36 = vmul.f32 1.442695, %v980_v26  ;;  %v1016_v37 = vmul.f32 1.442695, %v982_v27  ;;  %v1020_v38 = vmul.f32 1.442695, %v984_v28  ;;  %v926_v39 = vmax.f32 %v3316_v18, %v3322_v34 }
 0x141   : > { %v1024_v40 = vmul.f32 1.442695, %v986_v29  ;;  %v935_v41 = vmax.f32 %v3318_v19, %v3324_v35  ;;  %v1014_v42 = vmul.f32 1.442695, %v981_v30  ;;  %v1018_v43 = vmul.f32 1.442695, %v983_v31 }
 0x142   : > { %2873 = vpow2.f32 %v1012_v36  ;;  %v1022_v44 = vmul.f32 1.442695, %v985_v32  ;;  %v1026_v46 = vmul.f32 1.442695, %v987_v33 }
 0x143   : > { %2875 = vpow2.f32 %v1016_v37 }
 0x144   : > { %2877 = vpow2.f32 %v1020_v38 }
 0x145   : > { %2879 = vpow2.f32 %v1024_v40 }
 0x146   : > { %2881 = vpow2.f32 %v1014_v42 }
 0x147   : > { %2883 = vpow2.f32 %v1018_v43  ;;  %v3333_v47 = vpop.f32.mrf.mxu0  ;;  %v3335_v48 = vpop.f32.mrf.mxu1 }
 0x148   : > { %v3337_v49 = vpop.eup %2873  ;;  %v927_v50 = vmax.f32 %v926_v39, %v3333_v47  ;;  %v936_v51 = vmax.f32 %v935_v41, %v3335_v48  ;;  %2885 = vpow2.f32 %v1022_v44 }
 0x149   : > { %v3341_v52 = vpop.eup %2875  ;;  %2887 = vpow2.f32 %v1026_v46 }
 0x14a   : > { %v3343_v53 = vpop.eup %2877  ;;  %v1076_v54 = vadd.f32 %v3341_v52, %v3337_v49  ;;  %2738 = vmatmul.msk.bf16.gmra.mxu0 %vm570_vm8, %v2808_v45  ;;  %2762 = vmatmul.msk.bf16.gmra.mxu1 %vm570_vm8, %v2808_v45 }
 0x14b   : > { %v3349_v55 = vpop.eup %2879 }
 0x14c   : > { %v3351_v56 = vpop.eup %2881  ;;  %v1077_v57 = vadd.f32 %v3343_v53, %v1076_v54 }
 0x14d   : > { %v3354_v58 = vpop.eup %2883 }
 0x14e   : > { %v1078_v59 = vadd.f32 %v3349_v55, %v1077_v57  ;;  %v1085_v60 = vadd.f32 %v3354_v58, %v3351_v56  ;;  %v3359_v61 = vpop.eup %2885 }
 0x14f   : > { %v676_v62 = vpop.f32.mrf.mxu0  ;;  %v3361_v63 = vpop.f32.mrf.mxu1 }
 0x150   : > { %v1079_v0 = vrot.slane %v1078_v59, 4  ;;  %v1086_v1 = vadd.f32 %v3359_v61, %v1085_v60  ;;  %v928_v2 = vmax.f32 %v927_v50, %v676_v62  ;;  %v937_v3 = vmax.f32 %v936_v51, %v3361_v63  ;;  %v3365_v4 = vpop.eup %2887 }
 0x152   : > { %v1080_v5 = vadd.f32 %v1079_v0, %v1078_v59  ;;  %v1087_v6 = vadd.f32 %v3365_v4, %v1086_v1  ;;  %v929_v7 = vrot.slane %v928_v2, 4  ;;  %v938_v8 = vrot.slane %v937_v3, 4 }
 0x154   : > { %v1081_v9 = vrot.slane %v1080_v5, 2  ;;  %v1088_v10 = vrot.slane %v1087_v6, 4  ;;  %v930_v11 = vmax.f32 %v928_v2, %v929_v7  ;;  %v939_v12 = vmax.f32 %v937_v3, %v938_v8 }
 0x156   : > { %v1082_v13 = vadd.f32 %v1081_v9, %v1080_v5  ;;  %v1089_v14 = vadd.f32 %v1088_v10, %v1087_v6  ;;  %v931_v15 = vrot.slane %v930_v11, 2  ;;  %v940_v16 = vrot.slane %v939_v12, 2 }
 0x157   : > { %v3371_v20 = vpop.f32.mrf.mxu0  ;;  %v3373_v21 = vpop.f32.mrf.mxu1 }
 0x158   : > { %v1083_v22 = vrot.slane %v1082_v13, 1  ;;  %v1090_v23 = vrot.slane %v1089_v14, 2  ;;  %v932_v24 = vmax.f32 %v930_v11, %v931_v15  ;;  %v941_v25 = vmax.f32 %v939_v12, %v940_v16 }
 0x15a   : > { %v1084_v26 = vadd.f32 %v1083_v22, %v1082_v13  ;;  %v1091_v27 = vadd.f32 %v1090_v23, %v1089_v14  ;;  %v933_v28 = vrot.slane %v932_v24, 1  ;;  %v942_v29 = vrot.slane %v941_v25, 1  ;;  %2739 = vmatmul.msk.bf16.gmra.mxu0 %vm570_vm8, %v2809_v17  ;;  %2763 = vmatmul.msk.bf16.gmra.mxu1 %vm570_vm8, %v2809_v17 }
 0x15c   : > { %2889 = vrcp.f32 %v1084_v26  ;;  %v1092_v30 = vrot.slane %v1091_v27, 1  ;;  %v934_v31 = vmax.f32 %v932_v24, %v933_v28  ;;  %v943_v32 = vmax.f32 %v941_v25, %v942_v29 }
 0x15e   : > { %v1093_v33 = vadd.f32 %v1092_v30, %v1091_v27  ;;  %v988_v36 = vsub.f32 %v3316_v18, %v934_v31  ;;  %v990_v37 = vsub.f32 %v3322_v34, %v934_v31  ;;  %v992_v38 = vsub.f32 %v3333_v47, %v934_v31 }
 0x15f   : > { %v994_v39 = vsub.f32 %v676_v62, %v934_v31  ;;  %v989_v40 = vsub.f32 %v3318_v19, %v943_v32  ;;  %v991_v41 = vsub.f32 %v3324_v35, %v943_v32  ;;  %v993_v42 = vsub.f32 %v3335_v48, %v943_v32  ;;  %v3383_v43 = vpop.f32.mrf.mxu0  ;;  %v3385_v44 = vpop.f32.mrf.mxu1 }
 0x160   : > { %2891 = vrcp.f32 %v1093_v33  ;;  %v1028_v45 = vmul.f32 1.442695, %v988_v36  ;;  %v1032_v46 = vmul.f32 1.442695, %v990_v37  ;;  %v1036_v50 = vmul.f32 1.442695, %v992_v38 }
 0x161   : > { %v1040_v18 = vmul.f32 1.442695, %v994_v39  ;;  %v995_v34 = vsub.f32 %v3361_v63, %v943_v32  ;;  %v1030_v47 = vmul.f32 1.442695, %v989_v40  ;;  %v1034_v19 = vmul.f32 1.442695, %v991_v41 }
 0x162   : > { %v2890_v51 = vpop.eup %2889  ;;  %2893 = vpow2.f32 %v1028_v45  ;;  %v1038_v59 = vmul.f32 1.442695, %v993_v42  ;;  %v944_v63 = vmax.f32 %v3371_v20, %v3383_v43  ;;  %v953_v0 = vmax.f32 %v3373_v21, %v3385_v44 }
 0x163   : > { %2895 = vpow2.f32 %v1032_v46  ;;  %v1160_v35 = vmul.f32 %v2890_v51, %v3343_v53  ;;  %v1162_v48 = vmul.f32 %v2890_v51, %v3349_v55  ;;  %v1156_v54 = vmul.f32 %v2890_v51, %v3337_v49  ;;  %v2810_v53 = vld [vmem:[%s4338_s1 + $0x68] sm:$0xff] }
 0x164   : > { %2897 = vpow2.f32 %v1036_v50  ;;  %v1158_v57 = vmul.f32 %v2890_v51, %v3341_v52  ;;  %v1042_v62 = vmul.f32 1.442695, %v995_v34 }
 0x165   : > { %2899 = vpow2.f32 %v1040_v18 }
 0x166   : > { %v2892_v60 = vpop.eup %2891  ;;  %2901 = vpow2.f32 %v1030_v47 }
 0x167   : > { %2903 = vpow2.f32 %v1034_v19  ;;  %v3399_v55 = vpop.f32.mrf.mxu0  ;;  %v3401_v49 = vpop.f32.mrf.mxu1  ;;  %v1161_v52 = vmul.f32 %v2892_v60, %v3359_v61  ;;  %v1163_v1 = vmul.f32 %v2892_v60, %v3365_v4  ;;  %v1157_v2 = vmul.f32 %v2892_v60, %v3351_v56 }
 0x168   : > { %v3406_v3 = vpop.eup %2893  ;;  %v945_v5 = vmax.f32 %v944_v63, %v3399_v55  ;;  %v954_v6 = vmax.f32 %v953_v0, %v3401_v49  ;;  %v1159_v7 = vmul.f32 %v2892_v60, %v3354_v58  ;;  %2905 = vpow2.f32 %v1038_v59  ;;  %v2811_v59 = vld [vmem:[%s4338_s1 + $0x70] sm:$0xff] }
 0x169   : > { %v3411_v8 = vpop.eup %2895  ;;  %v2134_v9 = vpack.c.bf16 %v1161_v52, %v1160_v35  ;;  %v2135_v10 = vpack.c.bf16 %v1163_v1, %v1162_v48  ;;  %v2132_v11 = vpack.c.bf16 %v1157_v2, %v1156_v54  ;;  %2907 = vpow2.f32 %v1042_v62 }
 0x16a   : > { %v3413_v12 = vpop.eup %2897  ;;  %v1094_v61 = vadd.f32 %v3411_v8, %v3406_v3  ;;  %2740 = vmatmul.msk.bf16.gmra.mxu0 %vm570_vm8, %v2810_v53  ;;  %2764 = vmatmul.msk.bf16.gmra.mxu1 %vm570_vm8, %v2810_v53  ;;  %v2133_v56 = vpack.c.bf16 %v1159_v7, %v1158_v57 }
 0x16b   : > { %v3419_v4 = vpop.eup %2899  ;;  %v2166_v58 = vunpack.c.l.b16 %v2134_v9  ;;  %v2168_v13 = vunpack.c.l.b16 %v2135_v10  ;;  %v2167_v14 = vunpack.c.h.b16 %v2134_v9  ;;  %v2169_v15 = vunpack.c.h.b16 %v2135_v10 }
 0x16c   : > { %v3421_v16 = vpop.eup %2901  ;;  %v1095_v17 = vadd.f32 %v3413_v12, %v1094_v61  ;;  %v2162_v22 = vunpack.c.l.b16 %v2132_v11  ;;  %v2164_v23 = vunpack.c.l.b16 %v2133_v56  ;;  %v2163_v24 = vunpack.c.h.b16 %v2132_v11 }
 0x16d   : > { %v3424_v25 = vpop.eup %2903  ;;  %v3426_v26 = vpack.c.b16 %v2168_v13, %v2166_v58  ;;  %v3428_v27 = vpack.c.b16 %v2169_v15, %v2167_v14  ;;  %v2165_v28 = vunpack.c.h.b16 %v2133_v56 }
 0x16e   : > { %v1096_v29 = vadd.f32 %v3419_v4, %v1095_v17  ;;  %v1103_v30 = vadd.f32 %v3424_v25, %v3421_v16  ;;  %v3433_v31 = vpack.c.b16 %v2164_v23, %v2162_v22  ;;  %v3435_v32 = vpop.eup %2905 }
 0x16f   : > { %v686_v33 = vpop.f32.mrf.mxu0  ;;  %v3437_v36 = vpop.f32.mrf.mxu1  ;;  %v3439_v37 = vpack.c.b16 %v2165_v28, %v2163_v24 }
 0x170   : > { %v3441_v38 = vpop.eup %2907  ;;  %v1097_v39 = vrot.slane %v1096_v29, 4  ;;  %v1104_v40 = vadd.f32 %v3435_v32, %v1103_v30  ;;  %v946_v41 = vmax.f32 %v945_v5, %v686_v33  ;;  %v955_v42 = vmax.f32 %v954_v6, %v3437_v36 }
 0x172   : > { %v1098_v45 = vadd.f32 %v1097_v39, %v1096_v29  ;;  %v1105_v46 = vadd.f32 %v3441_v38, %v1104_v40  ;;  %v947_v50 = vrot.slane %v946_v41, 4  ;;  %v956_v18 = vrot.slane %v955_v42, 4 }
 0x174   : > { %v1099_v34 = vrot.slane %v1098_v45, 2  ;;  %v1106_v51 = vrot.slane %v1105_v46, 4  ;;  %v948_v47 = vmax.f32 %v946_v41, %v947_v50  ;;  %v957_v19 = vmax.f32 %v955_v42, %v956_v18 }
 0x176   : > { %v1100_v35 = vadd.f32 %v1099_v34, %v1098_v45  ;;  %v1107_v48 = vadd.f32 %v1106_v51, %v1105_v46  ;;  %v949_v54 = vrot.slane %v948_v47, 2  ;;  %v958_v57 = vrot.slane %v957_v19, 2 }
 0x177   : > { %v3449_v60 = vpop.f32.mrf.mxu0  ;;  %v3451_v62 = vpop.f32.mrf.mxu1 }
 0x178   : > { %v1101_v63 = vrot.slane %v1100_v35, 1  ;;  %v1108_v0 = vrot.slane %v1107_v48, 2  ;;  %v950_v53 = vmax.f32 %v948_v47, %v949_v54  ;;  %v959_v52 = vmax.f32 %v957_v19, %v958_v57 }
 0x17a   : > { %v1102_v1 = vadd.f32 %v1101_v63, %v1100_v35  ;;  %v1109_v2 = vadd.f32 %v1108_v0, %v1107_v48  ;;  %v951_v5 = vrot.slane %v950_v53, 1  ;;  %v960_v6 = vrot.slane %v959_v52, 1  ;;  %2741 = vmatmul.msk.bf16.gmra.mxu0 %vm570_vm8, %v2811_v59  ;;  %2765 = vmatmul.msk.bf16.gmra.mxu1 %vm570_vm8, %v2811_v59 }
 0x17c   : > { %2909 = vrcp.f32 %v1102_v1  ;;  %v1110_v7 = vrot.slane %v1109_v2, 1  ;;  %v952_v9 = vmax.f32 %v950_v53, %v951_v5  ;;  %v961_v10 = vmax.f32 %v959_v52, %v960_v6 }
 0x17e   : > { %v1111_v11 = vadd.f32 %v1110_v7, %v1109_v2  ;;  %v996_v61 = vsub.f32 %v3371_v20, %v952_v9  ;;  %v998_v56 = vsub.f32 %v3383_v43, %v952_v9  ;;  %v1000_v58 = vsub.f32 %v3399_v55, %v952_v9 }
 0x17f   : > { %v1002_v13 = vsub.f32 %v686_v33, %v952_v9  ;;  %v997_v14 = vsub.f32 %v3373_v21, %v961_v10  ;;  %v999_v15 = vsub.f32 %v3385_v44, %v961_v10  ;;  %v1001_v17 = vsub.f32 %v3401_v49, %v961_v10  ;;  %v3461_v22 = vpop.f32.mrf.mxu0  ;;  %v3463_v23 = vpop.f32.mrf.mxu1 }
 0x180   : > { %2911 = vrcp.f32 %v1111_v11  ;;  %v1044_v24 = vmul.f32 1.442695, %v996_v61  ;;  %v1048_v28 = vmul.f32 1.442695, %v998_v56  ;;  %v1052_v29 = vmul.f32 1.442695, %v1000_v58 }
 0x181   : > { %v1056_v20 = vmul.f32 1.442695, %v1002_v13  ;;  %v1003_v43 = vsub.f32 %v3437_v36, %v961_v10  ;;  %v1046_v55 = vmul.f32 1.442695, %v997_v14  ;;  %v1050_v44 = vmul.f32 1.442695, %v999_v15 }
 0x182   : > { %v2910_v30 = vpop.eup %2909  ;;  %2913 = vpow2.f32 %v1044_v24  ;;  %v1054_v40 = vmul.f32 1.442695, %v1001_v17  ;;  %v962_v36 = vmax.f32 %v3449_v60, %v3461_v22 }
 0x183   : > { %v1170_v21 = vmul.f32 %v2910_v30, %v3419_v4  ;;  %2915 = vpow2.f32 %v1048_v28  ;;  %v1168_v49 = vmul.f32 %v2910_v30, %v3413_v12  ;;  %v1164_v33 = vmul.f32 %v2910_v30, %v3406_v3  ;;  %v2812_v12 = vld [vmem:[%s4338_s1 + $0x78] sm:$0xff] }
 0x184   : > { %2917 = vpow2.f32 %v1052_v29  ;;  %v1166_v39 = vmul.f32 %v2910_v30, %v3411_v8  ;;  %v1058_v42 = vmul.f32 1.442695, %v1003_v43  ;;  %v971_v4 = vmax.f32 %v3451_v62, %v3463_v23 }
 0x185   : > { %2919 = vpow2.f32 %v1056_v20 }
 0x186   : > { %v2912_v41 = vpop.eup %2911  ;;  %2921 = vpow2.f32 %v1046_v55 }
 0x187   : > { %v1171_v45 = vmul.f32 %v2912_v41, %v3441_v38  ;;  %2923 = vpow2.f32 %v1050_v44  ;;  %v3478_v3 = vpop.f32.mrf.mxu0  ;;  %v3480_v8 = vpop.f32.mrf.mxu1  ;;  %v1169_v46 = vmul.f32 %v2912_v41, %v3435_v32  ;;  %v1165_v50 = vmul.f32 %v2912_v41, %v3421_v16 }
 0x188   : > { %v3484_v18 = vpop.eup %2913  ;;  %v963_v34 = vmax.f32 %v962_v36, %v3478_v3  ;;  %v972_v51 = vmax.f32 %v971_v4, %v3480_v8  ;;  %v1167_v47 = vmul.f32 %v2912_v41, %v3424_v25  ;;  %2925 = vpow2.f32 %v1054_v40 }
 0x189   : > { %v3489_v19 = vpop.eup %2915  ;;  %v2138_v38 = vpack.c.bf16 %v1169_v46, %v1168_v49  ;;  %v2139_v35 = vpack.c.bf16 %v1171_v45, %v1170_v21  ;;  %v2136_v48 = vpack.c.bf16 %v1165_v50, %v1164_v33  ;;  %2927 = vpow2.f32 %v1058_v42 }
 0x18a   : > { %v3491_v54 = vpop.eup %2917  ;;  %v1112_v32 = vadd.f32 %v3489_v19, %v3484_v18  ;;  %2742 = vmatmul.msk.bf16.gmra.mxu0 %vm570_vm8, %v2812_v12  ;;  %2766 = vmatmul.msk.bf16.gmra.mxu1 %vm570_vm8, %v2812_v12  ;;  %v2137_v16 = vpack.c.bf16 %v1167_v47, %v1166_v39 }
 0x18b   : > { %v3497_v57 = vpop.eup %2919  ;;  %v2241_v25 = vunpack.c.l.b16 %v2138_v38  ;;  %v2243_v59 = vunpack.c.l.b16 %v2139_v35  ;;  %v2242_v63 = vunpack.c.h.b16 %v2138_v38  ;;  %v2244_v0 = vunpack.c.h.b16 %v2139_v35 }
 0x18c   : > { %v3499_v53 = vpop.eup %2921  ;;  %v1113_v52 = vadd.f32 %v3491_v54, %v1112_v32  ;;  %v2237_v1 = vunpack.c.l.b16 %v2136_v48  ;;  %v2239_v2 = vunpack.c.l.b16 %v2137_v16  ;;  %v2238_v5 = vunpack.c.h.b16 %v2136_v48 }
 0x18d   : > { %v3502_v6 = vpop.eup %2923  ;;  %v3504_v7 = vpack.c.b16 %v2243_v59, %v2241_v25  ;;  %v3506_v9 = vpack.c.b16 %v2244_v0, %v2242_v63  ;;  %v2240_v10 = vunpack.c.h.b16 %v2137_v16 }
 0x18e   : > { %v1114_v11 = vadd.f32 %v3497_v57, %v1113_v52  ;;  %v1121_v61 = vadd.f32 %v3502_v6, %v3499_v53  ;;  %v3511_v56 = vpack.c.b16 %v2239_v2, %v2237_v1  ;;  %v3513_v58 = vpop.eup %2925 }
 0x18f   : > { %v696_v13 = vpop.f32.mrf.mxu0  ;;  %v3515_v14 = vpop.f32.mrf.mxu1  ;;  %v3517_v15 = vpack.c.b16 %v2240_v10, %v2238_v5 }
 0x190   : > { %v2928_v17 = vpop.eup %2927  ;;  %v1115_v24 = vrot.slane %v1114_v11, 4  ;;  %v1122_v28 = vadd.f32 %v3513_v58, %v1121_v61  ;;  %v964_v29 = vmax.f32 %v963_v34, %v696_v13  ;;  %v973_v20 = vmax.f32 %v972_v51, %v3515_v14 }
 0x192   : > { %v1116_v30 = vadd.f32 %v1115_v24, %v1114_v11  ;;  %v1123_v43 = vadd.f32 %v2928_v17, %v1122_v28  ;;  %v965_v55 = vrot.slane %v964_v29, 4  ;;  %v974_v21 = vrot.slane %v973_v20, 4 }
 0x194   : > { %v1117_v44 = vrot.slane %v1116_v30, 2  ;;  %v1124_v49 = vrot.slane %v1123_v43, 4  ;;  %v966_v33 = vmax.f32 %v964_v29, %v965_v55  ;;  %v975_v39 = vmax.f32 %v973_v20, %v974_v21 }
 0x196   : > { %v1118_v40 = vadd.f32 %v1117_v44, %v1116_v30  ;;  %v1125_v41 = vadd.f32 %v1124_v49, %v1123_v43  ;;  %v967_v42 = vrot.slane %v966_v33, 2  ;;  %v976_v36 = vrot.slane %v975_v39, 2 }
 0x197   : > { %v3521_v4 = vpop.f32.mrf.mxu0  ;;  %v3523_v12 = vpop.f32.mrf.mxu1 }
 0x198   : > { %v1119_v45 = vrot.slane %v1118_v40, 1  ;;  %v1126_v46 = vrot.slane %v1125_v41, 2  ;;  %v968_v50 = vmax.f32 %v966_v33, %v967_v42  ;;  %v977_v34 = vmax.f32 %v975_v39, %v976_v36 }
 0x19a   : > { %v1120_v51 = vadd.f32 %v1119_v45, %v1118_v40  ;;  %v1127_v47 = vadd.f32 %v1126_v46, %v1125_v41  ;;  %v969_v38 = vrot.slane %v968_v50, 1  ;;  %v978_v35 = vrot.slane %v977_v34, 1 }
 0x19c   : > { %2929 = vrcp.f32 %v1120_v51  ;;  %v1128_v48 = vrot.slane %v1127_v47, 1  ;;  %v970_v32 = vmax.f32 %v968_v50, %v969_v38  ;;  %v979_v16 = vmax.f32 %v977_v34, %v978_v35 }
 0x19e   : > { %v1129_v25 = vadd.f32 %v1128_v48, %v1127_v47  ;;  %v1004_v59 = vsub.f32 %v3449_v60, %v970_v32  ;;  %v1006_v63 = vsub.f32 %v3461_v22, %v970_v32  ;;  %v1008_v0 = vsub.f32 %v3478_v3, %v970_v32 }
 0x19f   : > { %v1010_v52 = vsub.f32 %v696_v13, %v970_v32  ;;  %v1005_v1 = vsub.f32 %v3451_v62, %v979_v16  ;;  %v1007_v2 = vsub.f32 %v3463_v23, %v979_v16  ;;  %v1009_v5 = vsub.f32 %v3480_v8, %v979_v16  ;;  %v3531_v10 = vpop.f32.mrf.mxu0  ;;  %v3533_v11 = vpop.f32.mrf.mxu1 }
 0x1a0   : > { %2931 = vrcp.f32 %v1129_v25  ;;  %v1060_v61 = vmul.f32 1.442695, %v1004_v59  ;;  %v1064_v24 = vmul.f32 1.442695, %v1006_v63  ;;  %v1068_v28 = vmul.f32 1.442695, %v1008_v0 }
 0x1a1   : > { %v1072_v60 = vmul.f32 1.442695, %v1010_v52  ;;  %v1011_v22 = vsub.f32 %v3515_v14, %v979_v16  ;;  %v1062_v3 = vmul.f32 1.442695, %v1005_v1  ;;  %v1066_v23 = vmul.f32 1.442695, %v1007_v2 }
 0x1a2   : > { %v2930_v29 = vpop.eup %2929  ;;  %2933 = vpow2.f32 %v1060_v61  ;;  %v1070_v30 = vmul.f32 1.442695, %v1009_v5 }
 0x1a3   : > { %v1178_v62 = vmul.f32 %v2930_v29, %v3497_v57  ;;  %2935 = vpow2.f32 %v1064_v24  ;;  %v1176_v8 = vmul.f32 %v2930_v29, %v3491_v54  ;;  %v1172_v13 = vmul.f32 %v2930_v29, %v3484_v18 }
 0x1a4   : > { %2937 = vpow2.f32 %v1068_v28  ;;  %v1174_v20 = vmul.f32 %v2930_v29, %v3489_v19  ;;  %v1074_v55 = vmul.f32 1.442695, %v1011_v22 }
 0x1a5   : > { %2939 = vpow2.f32 %v1072_v60 }
 0x1a6   : > { %v2932_v43 = vpop.eup %2931  ;;  %2941 = vpow2.f32 %v1062_v3 }
 0x1a7   : > { %v1179_v21 = vmul.f32 %v2932_v43, %v2928_v17  ;;  %2943 = vpow2.f32 %v1066_v23  ;;  %v3540_v14 = vpop.f32.mrf.mxu0  ;;  %v3542_v44 = vpop.f32.mrf.mxu1  ;;  %v1177_v57 = vmul.f32 %v2932_v43, %v3513_v58  ;;  %v1173_v54 = vmul.f32 %v2932_v43, %v3499_v53 }
 0x1a8   : > { %v3546_v49 = vpop.eup %2933  ;;  %v1194_v18 = vmax.f32 %v3540_v14, %v3542_v44  ;;  %v1175_v19 = vmul.f32 %v2932_v43, %v3502_v6  ;;  %2945 = vpow2.f32 %v1070_v30 }
 0x1a9   : > { %v2936_v33 = vpop.eup %2935  ;;  %v2142_v39 = vpack.c.bf16 %v1177_v57, %v1176_v8  ;;  %v2143_v17 = vpack.c.bf16 %v1179_v21, %v1178_v62  ;;  %v2140_v40 = vpack.c.bf16 %v1173_v54, %v1172_v13  ;;  %2947 = vpow2.f32 %v1074_v55 }
 0x1aa   : > { %v2938_v41 = vpop.eup %2937  ;;  %v1130_v42 = vadd.f32 %v2936_v33, %v3546_v49  ;;  %1195 = vmax.xlane.f32.xlu0 %v1194_v18  ;;  %v2141_v58 = vpack.c.bf16 %v1175_v19, %v1174_v20 }
 0x1ab   : > { %v2940_v36 = vpop.eup %2939  ;;  %v2316_v53 = vunpack.c.h.b16 %v2142_v39  ;;  %v2318_v45 = vunpack.c.h.b16 %v2143_v17  ;;  %v2315_v46 = vunpack.c.l.b16 %v2142_v39  ;;  %v2317_v50 = vunpack.c.l.b16 %v2143_v17 }
 0x1ac   : > { %v2942_v34 = vpop.eup %2941  ;;  %v1131_v51 = vadd.f32 %v2938_v41, %v1130_v42  ;;  %v2311_v47 = vunpack.c.l.b16 %v2140_v40  ;;  %v2313_v6 = vunpack.c.l.b16 %v2141_v58  ;;  %v2312_v38 = vunpack.c.h.b16 %v2140_v40 }
 0x1ad   : > { %v2944_v35 = vpop.eup %2943  ;;  %v3552_v48 = vpack.c.b16 %v2318_v45, %v2316_v53  ;;  %v3554_v32 = vpack.c.b16 %v2317_v50, %v2315_v46  ;;  %v2314_v16 = vunpack.c.h.b16 %v2141_v58 }
 0x1ae   : > { %v1132_v25 = vadd.f32 %v2940_v36, %v1131_v51  ;;  %v1139_v59 = vadd.f32 %v2944_v35, %v2942_v34  ;;  %v3556_v63 = vpack.c.b16 %v2313_v6, %v2311_v47  ;;  %v2946_v0 = vpop.eup %2945 }
 0x1af   : > { %4369 = vst [vmem:[#allocation5_spill] sm:$0xff] %v3552_v48  ;;  %v3558_v52 = vpop.f32.mrf.mxu0  ;;  %v3560_v1 = vpop.f32.mrf.mxu1  ;;  %v3562_v2 = vpack.c.b16 %v2314_v16, %v2312_v38  ;;  %v3738_v48 = vld [vmem:[%s4343_s6 + $0x20] sm:$0xff] }
 0x1b0   : > { %4370 = vst [vmem:[#allocation6_spill] sm:$0xff] %v3554_v32  ;;  %v2948_v5 = vpop.eup %2947  ;;  %v1133_v61 = vrot.slane %v1132_v25, 4  ;;  %v1140_v24 = vadd.f32 %v2946_v0, %v1139_v59  ;;  %v1197_v28 = vmax.f32 %v3558_v52, %v3560_v1 }
 0x1b1   : > { %4371 = vst [vmem:[#allocation7_spill] sm:$0xff] %v3556_v63 }
 0x1b2   : > { %4372 = vst [vmem:[#allocation8_spill] sm:$0xff] %v3562_v2  ;;  %v1134_v60 = vadd.f32 %v1133_v61, %v1132_v25  ;;  %v1141_v29 = vadd.f32 %v2948_v5, %v1140_v24  ;;  %1198 = vmax.xlane.f32.xlu0 %v1197_v28 }
 0x1b4   : > { %v1135_v22 = vrot.slane %v1134_v60, 2  ;;  %v1142_v3 = vrot.slane %v1141_v29, 4 }
 0x1b6   : > { %v1136_v62 = vadd.f32 %v1135_v22, %v1134_v60  ;;  %v1143_v23 = vadd.f32 %v1142_v3, %v1141_v29 }
 0x1b7   : > { %v3566_v8 = vpop.f32.mrf.mxu0  ;;  %v3568_v13 = vpop.f32.mrf.mxu1 }
 0x1b8   : > { %v1137_v20 = vrot.slane %v1136_v62, 1  ;;  %v1144_v30 = vrot.slane %v1143_v23, 2  ;;  %v1200_v43 = vmax.f32 %v3566_v8, %v3568_v13 }
 0x1ba   : > { %v1138_v55 = vadd.f32 %v1137_v20, %v1136_v62  ;;  %v1145_v21 = vadd.f32 %v1144_v30, %v1143_v23  ;;  %1201 = vmax.xlane.f32.xlu2 %v1200_v43 }
 0x1bc   : > { %2949 = vrcp.f32 %v1138_v55  ;;  %v1146_v57 = vrot.slane %v1145_v21, 1 }
 0x1be   : > { %v1147_v54 = vadd.f32 %v1146_v57, %v1145_v21 }
 0x1bf   : > { %v3572_v18 = vpop.f32.mrf.mxu0  ;;  %v3574_v19 = vpop.f32.mrf.mxu1 }
 0x1c0   : > { %2951 = vrcp.f32 %v1147_v54  ;;  %v1203_v39 = vmax.f32 %v3572_v18, %v3574_v19 }
 0x1c2   : > { %v2950_v17 = vpop.eup %2949  ;;  %1204 = vmax.xlane.f32.xlu1 %v1203_v39 }
 0x1c3   : > { %v1186_v40 = vmul.f32 %v2950_v17, %v2940_v36  ;;  %v1184_v42 = vmul.f32 %v2950_v17, %v2938_v41  ;;  %v1180_v58 = vmul.f32 %v2950_v17, %v3546_v49  ;;  %v1182_v53 = vmul.f32 %v2950_v17, %v2936_v33 }
 0x1c6   : > { %v2952_v45 = vpop.eup %2951 }
 0x1c7   : > { %v1187_v46 = vmul.f32 %v2952_v45, %v2948_v5  ;;  %v3579_v50 = vpop.f32.mrf.mxu0  ;;  %v3581_v51 = vpop.f32.mrf.mxu1  ;;  %v1185_v47 = vmul.f32 %v2952_v45, %v2946_v0  ;;  %v1181_v6 = vmul.f32 %v2952_v45, %v2942_v34  ;;  %v1183_v38 = vmul.f32 %v2952_v45, %v2944_v35 }
 0x1c8   : > { %v1206_v16 = vmax.f32 %v3579_v50, %v3581_v51 }
 0x1c9   : > { %v2146_v25 = vpack.c.bf16 %v1185_v47, %v1184_v42  ;;  %v2147_v59 = vpack.c.bf16 %v1187_v46, %v1186_v40  ;;  %v2144_v61 = vpack.c.bf16 %v1181_v6, %v1180_v58  ;;  %v2145_v36 = vpack.c.bf16 %v1183_v38, %v1182_v53 }
 0x1ca   : > { %1207 = vmax.xlane.f32.xlu2 %v1206_v16 }
 0x1cb   : > { %v2389_v41 = vunpack.c.l.b16 %v2146_v25  ;;  %v2391_v49 = vunpack.c.l.b16 %v2147_v59  ;;  %v2390_v33 = vunpack.c.h.b16 %v2146_v25  ;;  %v2392_v24 = vunpack.c.h.b16 %v2147_v59 }
 0x1cc   : > { %v2385_v5 = vunpack.c.l.b16 %v2144_v61  ;;  %v2387_v28 = vunpack.c.l.b16 %v2145_v36  ;;  %v2386_v60 = vunpack.c.h.b16 %v2144_v61  ;;  %v2388_v29 = vunpack.c.h.b16 %v2145_v36 }
 0x1cd   : > { %v3585_v22 = vpack.c.b16 %v2391_v49, %v2389_v41  ;;  %v3587_v34 = vpack.c.b16 %v2392_v24, %v2390_v33 }
 0x1ce   : > { %v3589_v35 = vpack.c.b16 %v2387_v28, %v2385_v5  ;;  %v3591_v0 = vpack.c.b16 %v2388_v29, %v2386_v60  ;;  %v3650_v5 = vld [vmem:[%s4343_s6 + $0x40] sm:$0xff] }
 0x1cf   : > { %4373 = vst [vmem:[#allocation9_spill] sm:$0xff] %v3585_v22  ;;  %v3593_v3 = vpop.f32.mrf.mxu0  ;;  %v3595_v62 = vpop.f32.mrf.mxu1 }
 0x1d0   : > { %4374 = vst [vmem:[#allocation10_spill] sm:$0xff] %v3587_v34  ;;  %v1209_v23 = vmax.f32 %v3593_v3, %v3595_v62 }
 0x1d1   : > { %4375 = vst [vmem:[#allocation11_spill] sm:$0xff] %v3589_v35 }
 0x1d2   : > { %4376 = vst [vmem:[#allocation12_spill] sm:$0xff] %v3591_v0  ;;  %1210 = vmax.xlane.f32.xlu1 %v1209_v23 }
 0x1d3   : > { %4377 = vst [vmem:[#allocation13_spill] sm:$0xff] %v3650_v5 }
 0x1d7   : > { %v3599_v20 = vpop.f32.mrf.mxu0  ;;  %v3601_v30 = vpop.f32.mrf.mxu1 }
 0x1d8   : > { %v1212_v43 = vmax.f32 %v3599_v20, %v3601_v30 }
 0x1da   : > { %1213 = vmax.xlane.f32.xlu2 %v1212_v43  ;;  %v3660_v43 = vld [vmem:[%s4343_s6 + $0x48] sm:$0xff] }
 0x1db   : > { %4379 = vst [vmem:[#allocation15_spill] sm:$0xff] %v3660_v43 }
 0x1df   : > { %v3605_v55 = vpop.f32.mrf.mxu0  ;;  %v3607_v21 = vpop.f32.mrf.mxu1 }
 0x1e0   : > { %v1215_v57 = vmax.f32 %v3605_v55, %v3607_v21 }
 0x1e2   : > { %1216 = vmax.xlane.f32.xlu1 %v1215_v57 }
 0x1e7   : > { %v3611_v54 = vpop.f32.mrf.mxu0  ;;  %v3613_v39 = vpop.f32.mrf.mxu1 }
 0x1e8   : > { %v1218_v17 = vmax.f32 %v3611_v54, %v3613_v39 }
 0x1ea   : > { %1219 = vmax.xlane.f32.xlu2 %v1218_v17 }
 0x1ef   : > { %v3617_v40 = vpop.f32.mrf.mxu0  ;;  %v3619_v42 = vpop.f32.mrf.mxu1 }
 0x1f0   : > { %v1221_v58 = vmax.f32 %v3617_v40, %v3619_v42 }
 0x1f2   : > { %1222 = vmax.xlane.f32.xlu1 %v1221_v58 }
 0x1f7   : > { %v3623_v53 = vpop.f32.mrf.mxu0  ;;  %v3625_v45 = vpop.f32.mrf.mxu1 }
 0x1f8   : > { %v1224_v46 = vmax.f32 %v3623_v53, %v3625_v45 }
 0x1fa   : > { %1225 = vmax.xlane.f32.xlu1 %v1224_v46  ;;  %v3670_v46 = vld [vmem:[%s4343_s6 + $0x50] sm:$0xff] }
 0x1fb   : > { %4381 = vst [vmem:[#allocation17_spill] sm:$0xff] %v3670_v46 }
 0x1ff   : > { %v3629_v47 = vpop.f32.mrf.mxu0  ;;  %v3631_v6 = vpop.f32.mrf.mxu1 }
 0x200   : > { %v1227_v38 = vmax.f32 %v3629_v47, %v3631_v6 }
 0x202   : > { %1228 = vmax.xlane.f32.xlu2 %v1227_v38 }
 0x207   : > { %v3635_v16 = vpop.f32.mrf.mxu0  ;;  %v3637_v25 = vpop.f32.mrf.mxu1 }
 0x208   : > { %v1230_v59 = vmax.f32 %v3635_v16, %v3637_v25 }
 0x20a   : > { %1231 = vmax.xlane.f32.xlu0 %v1230_v59 }
 0x20f   : > { %v3641_v61 = vpop.f32.mrf.mxu0  ;;  %v3643_v36 = vpop.f32.mrf.mxu1 }
 0x210   : > { %v1233_v41 = vmax.f32 %v3641_v61, %v3643_v36 }
 0x212   : > { %1234 = vmax.xlane.f32.xlu1 %v1233_v41 }
 0x21d   : > { %v1196_v0 = vpop.xlane.xlu0 %1195 }
 0x225   : > { %v1199_v58 = vpop.xlane.xlu0 %1198 }
 0x22d   : > { %v1202_v49 = vpop.xlane.xlu2 %1201 }
 0x235   : > { %v1205_v33 = vpop.xlane.xlu1 %1204 }
 0x23d   : > { %v1208_v24 = vpop.xlane.xlu2 %1207 }
 0x245   : > { %v1211_v28 = vpop.xlane.xlu1 %1210 }
 0x24d   : > { %v1214_v60 = vpop.xlane.xlu2 %1213 }
 0x24e   : > { %v3653_v29 = vmax.f32 %v1214_v60, %v3650_v5  ;;  %v3680_v60 = vld [vmem:[%s4343_s6 + $0x58] sm:$0xff] }
 0x24f   : > { %4383 = vst [vmem:[#allocation19_spill] sm:$0xff] %v3680_v60 }
 0x250   : > { %4378 = vst [vmem:[#allocation14_spill] sm:$0xff] %v3653_v29 }
 0x255   : > { %v1217_v57 = vpop.xlane.xlu1 %1216 }
 0x256   : > { %v3663_v17 = vmax.f32 %v1217_v57, %v3660_v43 }
 0x258   : > { %4380 = vst [vmem:[#allocation16_spill] sm:$0xff] %v3663_v17 }
 0x25d   : > { %v1220_v38 = vpop.xlane.xlu2 %1219 }
 0x25e   : > { %v3673_v59 = vmax.f32 %v1220_v38, %v3670_v46  ;;  %v3690_v38 = vld [vmem:[%s4343_s6 + $0x60] sm:$0xff] }
 0x25f   : > { %4385 = vst [vmem:[#allocation21_spill] sm:$0xff] %v3690_v38 }
 0x260   : > { %4382 = vst [vmem:[#allocation18_spill] sm:$0xff] %v3673_v59 }
 0x265   : > { %v1223_v57 = vpop.xlane.xlu1 %1222 }
 0x266   : > { %v3683_v23 = vmax.f32 %v1223_v57, %v3680_v60  ;;  %v3701_v57 = vld [vmem:[%s4343_s6 + $0x68] sm:$0xff] }
 0x267   : > { %4387 = vst [vmem:[#allocation23_spill] sm:$0xff] %v3701_v57 }
 0x268   : > { %4384 = vst [vmem:[#allocation20_spill] sm:$0xff] %v3683_v23 }
 0x26d   : > { %v1226_v35 = vpop.xlane.xlu1 %1225 }
 0x26e   : > { %v3693_v41 = vmax.f32 %v1226_v35, %v3690_v38  ;;  %v3712_v35 = vld [vmem:[%s4343_s6 + $0x70] sm:$0xff]  ;;  %v3783_v38 = vld [vmem:[%s4343_s6 + $0x38] sm:$0xff] }
 0x26f   : > { %4389 = vst [vmem:[#allocation25_spill] sm:$0xff] %v3712_v35 }
 0x270   : > { %4386 = vst [vmem:[#allocation22_spill] sm:$0xff] %v3693_v41  ;;  %1330 = vperm.xlu2 %2867, %v3693_v41   ;;  %v3769_v41 = vld [vmem:[%s4343_s6 + $0x30] sm:$0xff] }
 0x271   : > { %4395 = vst [vmem:[#allocation31_spill] sm:$0xff] %v3769_v41 }
 0x275   : > { %v1229_v22 = vpop.xlane.xlu2 %1228 }
 0x276   : > { %v3704_v63 = vmax.f32 %v1229_v22, %v3701_v57  ;;  %v3724_v22 = vld [vmem:[%s4343_s6 + $0x78] sm:$0xff]  ;;  %v3741_v57 = vmax.f32 %v1202_v49, %v3738_v48  ;;  %v3758_v49 = vld [vmem:[%s4343_s6 + $0x10] sm:$0xff] }
 0x277   : > { %4391 = vst [vmem:[#allocation27_spill] sm:$0xff] %v3724_v22 }
 0x278   : > { %4388 = vst [vmem:[#allocation24_spill] sm:$0xff] %v3704_v63  ;;  %1335 = vperm.xlu0 %2866, %v3704_v63  }
 0x27d   : > { %v1232_v34 = vpop.xlane.xlu0 %1231 }
 0x27e   : > { %v3715_v32 = vmax.f32 %v1232_v34, %v3712_v35 }
 0x280   : > { %4390 = vst [vmem:[#allocation26_spill] sm:$0xff] %v3715_v32  ;;  %1320 = vperm.xlu0 %2866, %v3673_v59   ;;  %1340 = vperm.xlu2 %2867, %v3715_v32   ;;  %v3789_v32 = vmax.f32 %v1211_v28, %v3783_v38 }
 0x285   : > { %v1235_v2 = vpop.xlane.xlu1 %1234 }
 0x286   : > { %v3727_v63 = vmax.f32 %v1235_v2, %v3724_v22  ;;  %v3747_v2 = vld [vmem:[%s4343_s6 + $0x28] sm:$0xff]  ;;  %v3761_v22 = vmax.f32 %v1196_v0, %v3758_v49  ;;  %v3778_v0 = vld [vmem:[%s4343_s6 + $0x18] sm:$0xff] }
 0x287   : > { %4393 = vst [vmem:[#allocation29_spill] sm:$0xff] %v3747_v2  ;;  %v3750_v34 = vmax.f32 %v1205_v33, %v3747_v2  ;;  %v1191_v33 = vmax.f32 %v3531_v10, %v3533_v11 }
 0x288   : > { %4392 = vst [vmem:[#allocation28_spill] sm:$0xff] %v3727_v63  ;;  %1325 = vperm.xlu0 %2866, %v3683_v23   ;;  %1345 = vperm.xlu1 %2868, %v3727_v63   ;;  %v1188_v63 = vmax.f32 %v3521_v4, %v3523_v12 }
 0x289   : > { %4394 = vst [vmem:[#allocation30_spill] sm:$0xff] %v3750_v34 }
 0x290   : > { %1310 = vperm.xlu0 %2866, %v3653_v29  }
 0x298   : > { %1315 = vperm.xlu0 %2866, %v3663_v17  }
 0x2a0   : > { %1290 = vperm.xlu0 %2866, %v3741_v57  }
 0x2a8   : > { %1295 = vperm.xlu0 %2866, %v3750_v34  }
 0x2a9   : > { %1189 = vmax.xlane.f32.xlu2 %v1188_v63  ;;  %v3772_v63 = vmax.f32 %v1208_v24, %v3769_v41 }
 0x2ab   : > { %4396 = vst [vmem:[#allocation32_spill] sm:$0xff] %v3772_v63 }
 0x2b0   : > { %1280 = vperm.xlu0 %2866, %v3761_v22  }
 0x2b2   : > { %1192 = vmax.xlane.f32.xlu1 %v1191_v33  ;;  %v3786_v33 = vmax.f32 %v1199_v58, %v3778_v0 }
 0x2c1   : > { %1300 = vperm.xlu2 %2867, %v3772_v63  }
 0x2c9   : > { %1285 = vperm.xlu2 %2867, %v3786_v33  }
 0x2ca   : > { %v1331_v24 = vpop.permute.xlu2 %1330 }
 0x2cb   : > { %v1372_v35 = vsub.f32 %v3623_v53, %v1331_v24  ;;  %v1373_v23 = vsub.f32 %v3625_v45, %v1331_v24  ;;  %1305 = vperm.xlu1 %2868, %v3789_v32  }
 0x2cd   : > { %v1428_v60 = vmul.f32 1.442695, %v1372_v35  ;;  %v1430_v29 = vmul.f32 1.442695, %v1373_v23 }
 0x2cf   : > { %2953 = vpow2.f32 %v1428_v60 }
 0x2d0   : > { %2955 = vpow2.f32 %v1430_v29 }
 0x2d5   : > { %v3795_v5 = vpop.eup %2953 }
 0x2d6   : > { %v3797_v58 = vpop.eup %2955 }
 0x2d7   : > { %v3801_v28 = vadd.f32 %v3797_v58, %v3795_v5 }
 0x2da   : > { %v1341_v2 = vpop.permute.xlu2 %1340 }
 0x2db   : > { %v1376_v34 = vsub.f32 %v3635_v16, %v1341_v2  ;;  %v1377_v53 = vsub.f32 %v3637_v25, %v1341_v2 }
 0x2dd   : > { %v1436_v45 = vmul.f32 1.442695, %v1376_v34  ;;  %v1438_v24 = vmul.f32 1.442695, %v1377_v53 }
 0x2df   : > { %2957 = vpow2.f32 %v1436_v45 }
 0x2e0   : > { %2959 = vpow2.f32 %v1438_v24 }
 0x2e5   : > { %v2958_v23 = vpop.eup %2957 }
 0x2e6   : > { %v2960_v60 = vpop.eup %2959 }
 0x2e7   : > { %v3805_v29 = vadd.f32 %v2960_v60, %v2958_v23 }
 0x2ea   : > { %v1336_v35 = vpop.permute.xlu0 %1335 }
 0x2eb   : > { %v1374_v17 = vsub.f32 %v3629_v47, %v1336_v35  ;;  %v1375_v43 = vsub.f32 %v3631_v6, %v1336_v35 }
 0x2ed   : > { %v1432_v59 = vmul.f32 1.442695, %v1374_v17  ;;  %v1434_v46 = vmul.f32 1.442695, %v1375_v43 }
 0x2ef   : > { %2961 = vpow2.f32 %v1432_v59 }
 0x2f0   : > { %2963 = vpow2.f32 %v1434_v46 }
 0x2f2   : > { %v1321_v16 = vpop.permute.xlu0 %1320 }
 0x2f3   : > { %v1368_v25 = vsub.f32 %v3611_v54, %v1321_v16  ;;  %v1369_v34 = vsub.f32 %v3613_v39, %v1321_v16 }
 0x2f5   : > { %v2962_v2 = vpop.eup %2961  ;;  %v1420_v53 = vmul.f32 1.442695, %v1368_v25  ;;  %v1422_v45 = vmul.f32 1.442695, %v1369_v34 }
 0x2f6   : > { %v2964_v24 = vpop.eup %2963 }
 0x2f7   : > { %2965 = vpow2.f32 %v1420_v53  ;;  %v3811_v41 = vadd.f32 %v2964_v24, %v2962_v2 }
 0x2f8   : > { %2967 = vpow2.f32 %v1422_v45 }
 0x2fa   : > { %v1326_v47 = vpop.permute.xlu0 %1325  ;;  %v1346_v63 = vpop.permute.xlu1 %1345 }
 0x2fb   : > { %v1370_v6 = vsub.f32 %v3617_v40, %v1326_v47  ;;  %v1371_v43 = vsub.f32 %v3619_v42, %v1326_v47  ;;  %v1378_v17 = vsub.f32 %v3641_v61, %v1346_v63  ;;  %v1379_v54 = vsub.f32 %v3643_v36, %v1346_v63 }
 0x2fd   : > { %v2966_v46 = vpop.eup %2965  ;;  %v1424_v39 = vmul.f32 1.442695, %v1370_v6  ;;  %v1426_v59 = vmul.f32 1.442695, %v1371_v43  ;;  %v1440_v35 = vmul.f32 1.442695, %v1378_v17 }
 0x2fe   : > { %v2968_v16 = vpop.eup %2967  ;;  %v1442_v25 = vmul.f32 1.442695, %v1379_v54 }
 0x2ff   : > { %2969 = vpow2.f32 %v1424_v39  ;;  %v3817_v34 = vadd.f32 %v2968_v16, %v2966_v46 }
 0x300   : > { %2971 = vpow2.f32 %v1426_v59 }
 0x301   : > { %2973 = vpow2.f32 %v1440_v35  ;;  %v2813_v35 = vld [vmem:[%s4338_s1 + $0x80] sm:$0xff] }
 0x302   : > { %2975 = vpow2.f32 %v1442_v25  ;;  %v1311_v53 = vpop.permute.xlu0 %1310  ;;  %2743 = vmatmul.msk.bf16.gmra.mxu0 %vm570_vm8, %v2813_v35  ;;  %2767 = vmatmul.msk.bf16.gmra.mxu1 %vm570_vm8, %v2813_v35 }
 0x303   : > { %v1364_v40 = vsub.f32 %v3599_v20, %v1311_v53  ;;  %v1365_v42 = vsub.f32 %v3601_v30, %v1311_v53 }
 0x305   : > { %v2970_v61 = vpop.eup %2969  ;;  %v1412_v45 = vmul.f32 1.442695, %v1364_v40  ;;  %v1414_v36 = vmul.f32 1.442695, %v1365_v42 }
 0x306   : > { %v2972_v63 = vpop.eup %2971 }
 0x307   : > { %v2974_v47 = vpop.eup %2973  ;;  %2977 = vpow2.f32 %v1412_v45  ;;  %v3821_v6 = vadd.f32 %v2972_v63, %v2970_v61 }
 0x308   : > { %v2976_v43 = vpop.eup %2975  ;;  %2979 = vpow2.f32 %v1414_v36  ;;  %v1634_v17 = vpack.c.bf16 %v2974_v47, %v2958_v23 }
 0x309   : > { %v1635_v54 = vpack.c.bf16 %v2976_v43, %v2960_v60  ;;  %v3823_v39 = vadd.f32 %v2976_v43, %v2974_v47 }
 0x30a   : > { %1636 = vmatpush.bf16.xpose.msra.mxu2 %v1634_v17  ;;  %v1316_v59 = vpop.permute.xlu0 %1315 }
 0x30b   : > { %1685 = vmatpush.bf16.xpose.msra.mxu3 %v1635_v54  ;;  %v1366_v20 = vsub.f32 %v3605_v55, %v1316_v59  ;;  %v1367_v30 = vsub.f32 %v3607_v21, %v1316_v59  ;;  %v1632_v55 = vpack.c.bf16 %v2962_v2, %v3795_v5  ;;  %v1633_v21 = vpack.c.bf16 %v2964_v24, %v3797_v58 }
 0x30c   : > { %v1630_v5 = vpack.c.bf16 %v2970_v61, %v2966_v46  ;;  %v1631_v58 = vpack.c.bf16 %v2972_v63, %v2968_v16  ;;  %v1448_v61 = vsub.f32 %v3738_v48, %v3741_v57 }
 0x30d   : > { %v2978_v25 = vpop.eup %2977  ;;  %v1416_v53 = vmul.f32 1.442695, %v1366_v20  ;;  %v1418_v40 = vmul.f32 1.442695, %v1367_v30  ;;  %v1446_v20 = vsub.f32 %v3758_v49, %v3761_v22 }
 0x30e   : > { %v2980_v42 = vpop.eup %2979 }
 0x30f   : > { %2981 = vpow2.f32 %v1416_v53  ;;  %v3832_v23 = vadd.f32 %v2980_v42, %v2978_v25  ;;  %v1464_v2 = vmul.f32 1.442695, %v1446_v20  ;;  %v1237_v53 = vld [vmem:[%s4343_s6 + $0x8] sm:$0xff] }
 0x310   : > { %2983 = vpow2.f32 %v1418_v40  ;;  %v1468_v40 = vmul.f32 1.442695, %v1448_v61 }
 0x312   : > { %1637 = vmatpush.bf16.xpose.msra.mxu2 %v1632_v55  ;;  %v1291_v60 = vpop.permute.xlu0 %1290 }
 0x313   : > { %1686 = vmatpush.bf16.xpose.msra.mxu3 %v1633_v21  ;;  %v1356_v45 = vsub.f32 %v3566_v8, %v1291_v60  ;;  %v1357_v36 = vsub.f32 %v3568_v13, %v1291_v60  ;;  %v3845_v8 = vld [vmem:[%s4343_s6] sm:$0xff]  ;;  %v2814_v13 = vld [vmem:[%s4338_s1 + $0x88] sm:$0xff] }
 0x314   : > { %2744 = vmatmul.msk.bf16.gmra.mxu0 %vm570_vm8, %v2814_v13  ;;  %2768 = vmatmul.msk.bf16.gmra.mxu1 %vm570_vm8, %v2814_v13 }
 0x315   : > { %v2982_v47 = vpop.eup %2981  ;;  %v1396_v43 = vmul.f32 1.442695, %v1356_v45  ;;  %v1398_v17 = vmul.f32 1.442695, %v1357_v36 }
 0x316   : > { %v2984_v54 = vpop.eup %2983  ;;  %v1628_v63 = vpack.c.bf16 %v2982_v47, %v2978_v25 }
 0x317   : > { %2985 = vpow2.f32 %v1396_v43  ;;  %v3838_v59 = vadd.f32 %v2984_v54, %v2982_v47  ;;  %v1629_v35 = vpack.c.bf16 %v2984_v54, %v2980_v42 }
 0x318   : > { %2987 = vpow2.f32 %v1398_v17 }
 0x319   : > { %2989 = vpow2.f32 %v1464_v2 }
 0x31a   : > { %1638 = vmatpush.bf16.xpose.msra.mxu2 %v1630_v5  ;;  %2991 = vpow2.f32 %v1468_v40  ;;  %v1296_v2 = vpop.permute.xlu0 %1295 }
 0x31b   : > { %1687 = vmatpush.bf16.xpose.msra.mxu3 %v1631_v58 }
 0x31c   : > { %v1190_v24 = vpop.xlane.xlu2 %1189 }
 0x31d   : > { %v3850_v30 = vpop.eup %2985  ;;  %v3853_v22 = vmax.f32 %v1190_v24, %v3845_v8 }
 0x31e   : > { %v3855_v49 = vpop.eup %2987 }
 0x31f   : > { %v1444_v46 = vsub.f32 %v3845_v8, %v3853_v22  ;;  %1270 = vperm.xlu1 %2868, %v3853_v22   ;;  %v3864_v16 = vadd.f32 %v3855_v49, %v3850_v30  ;;  %v3873_v36 = vpop.eup %2989 }
 0x320   : > { %v3881_v54 = vpop.eup %2991 }
 0x322   : > { %1639 = vmatpush.bf16.xpose.msra.mxu2 %v1628_v63 }
 0x323   : > { %1688 = vmatpush.bf16.xpose.msra.mxu3 %v1629_v35  ;;  %v2816_v35 = vld [vmem:[%s4338_s1 + $0x98] sm:$0xff] }
 0x324   : > { %v1301_v55 = vpop.permute.xlu2 %1300 }
 0x325   : > { %v1360_v21 = vsub.f32 %v3579_v50, %v1301_v55  ;;  %v1361_v60 = vsub.f32 %v3581_v51, %v1301_v55  ;;  %v1193_v45 = vpop.xlane.xlu1 %1192  ;;  %v2815_v50 = vld [vmem:[%s4338_s1 + $0x90] sm:$0xff] }
 0x326   : > { %v1253_v43 = vmax.f32 %v1193_v45, %v1237_v53  ;;  %2745 = vmatmul.msk.bf16.gmra.mxu0 %vm570_vm8, %v2815_v50  ;;  %2769 = vmatmul.msk.bf16.gmra.mxu1 %vm570_vm8, %v2815_v50 }
 0x327   : > { %v1404_v17 = vmul.f32 1.442695, %v1360_v21  ;;  %v1406_v48 = vmul.f32 1.442695, %v1361_v60  ;;  %1821 = vperm.xlu1 %2868, %v3873_v36  }
 0x328   : > { %v1445_v57 = vsub.f32 %v1237_v53, %v1253_v43  ;;  %1275 = vperm.xlu0 %2866, %v1253_v43   ;;  %v1281_v53 = vpop.permute.xlu0 %1280  ;;  %v1358_v43 = vsub.f32 %v3572_v18, %v1296_v2  ;;  %v2817_v18 = vld [vmem:[%s4338_s1 + $0xa0] sm:$0xff] }
 0x329   : > { %2993 = vpow2.f32 %v1404_v17  ;;  %v1352_v55 = vsub.f32 %v3540_v14, %v1281_v53  ;;  %v1353_v45 = vsub.f32 %v3542_v44, %v1281_v53 }
 0x32a   : > { %2995 = vpow2.f32 %v1406_v48  ;;  %v1462_v25 = vmul.f32 1.442695, %v1445_v57  ;;  %v1359_v57 = vsub.f32 %v3574_v19, %v1296_v2  ;;  %v1400_v14 = vmul.f32 1.442695, %v1358_v43 }
 0x32b   : > { %v1390_v50 = vmul.f32 1.442695, %v1353_v45 }
 0x32c   : > { %2997 = vpow2.f32 %v1462_v25  ;;  %v1286_v51 = vpop.permute.xlu2 %1285  ;;  %v1388_v25 = vmul.f32 1.442695, %v1352_v55 }
 0x32d   : > { %v1354_v42 = vsub.f32 %v3558_v52, %v1286_v51  ;;  %v1355_v47 = vsub.f32 %v3560_v1, %v1286_v51 }
 0x32f   : > { %v2994_v20 = vpop.eup %2993  ;;  %v1392_v5 = vmul.f32 1.442695, %v1354_v42  ;;  %v1394_v58 = vmul.f32 1.442695, %v1355_v47  ;;  %1827 = vperm.xlu1 %2868, %v3881_v54  }
 0x330   : > { %v2996_v13 = vpop.eup %2995 }
 0x331   : > { %2999 = vpow2.f32 %v1392_v5  ;;  %v3886_v24 = vadd.f32 %v2996_v13, %v2994_v20 }
 0x332   : > { %v3888_v61 = vpop.eup %2997  ;;  %3001 = vpow2.f32 %v1394_v58 }
 0x333   : > { %1818 = vperm.xlu2 %2867, %v3888_v61  }
 0x336   : > { %2746 = vmatmul.msk.bf16.gmra.mxu0 %vm570_vm8, %v2816_v35  ;;  %2770 = vmatmul.msk.bf16.gmra.mxu1 %vm570_vm8, %v2816_v35 }
 0x337   : > { %v3000_v52 = vpop.eup %2999 }
 0x338   : > { %v3002_v1 = vpop.eup %3001 }
 0x339   : > { %v3891_v63 = vadd.f32 %v3002_v1, %v3000_v52 }
 0x33d   : > { %v1306_v40 = vpop.permute.xlu1 %1305 }
 0x33e   : > { %v1362_v21 = vsub.f32 %v3593_v3, %v1306_v40  ;;  %v1363_v60 = vsub.f32 %v3595_v62, %v1306_v40  ;;  %v1402_v3 = vmul.f32 1.442695, %v1359_v57 }
 0x340   : > { %v1408_v17 = vmul.f32 1.442695, %v1362_v21  ;;  %v1410_v48 = vmul.f32 1.442695, %v1363_v60  ;;  %v2818_v21 = vld [vmem:[%s4338_s1 + $0xa8] sm:$0xff] }
 0x342   : > { %3003 = vpow2.f32 %v1408_v17 }
 0x343   : > { %3005 = vpow2.f32 %v1410_v48 }
 0x344   : > { %3007 = vpow2.f32 %v1388_v25 }
 0x345   : > { %3009 = vpow2.f32 %v1390_v50 }
 0x346   : > { %3011 = vpow2.f32 %v1400_v14  ;;  %2747 = vmatmul.msk.bf16.gmra.mxu0 %vm570_vm8, %v2817_v18  ;;  %2771 = vmatmul.msk.bf16.gmra.mxu1 %vm570_vm8, %v2817_v18 }
 0x347   : > { %3013 = vpow2.f32 %v1402_v3 }
 0x348   : > { %v3004_v62 = vpop.eup %3003 }
 0x349   : > { %v3006_v51 = vpop.eup %3005  ;;  %v1626_v42 = vpack.c.bf16 %v3004_v62, %v2994_v20 }
 0x34a   : > { %v1627_v44 = vpack.c.bf16 %v3006_v51, %v2996_v13  ;;  %v3907_v47 = vadd.f32 %v3006_v51, %v3004_v62  ;;  %v3008_v19 = vpop.eup %3007 }
 0x34b   : > { %1640 = vmatpush.bf16.xpose.msra.mxu2 %v1626_v42  ;;  %v3010_v5 = vpop.eup %3009  ;;  %v1622_v40 = vpack.c.bf16 %v3000_v52, %v3008_v19 }
 0x34c   : > { %1689 = vmatpush.bf16.xpose.msra.mxu3 %v1627_v44  ;;  %v3012_v58 = vpop.eup %3011  ;;  %v1498_v35 = vadd.f32 %v3010_v5, %v3008_v19  ;;  %v1623_v55 = vpack.c.bf16 %v3002_v1, %v3010_v5 }
 0x34d   : > { %v3014_v2 = vpop.eup %3013  ;;  %v1624_v20 = vpack.c.bf16 %v3012_v58, %v3850_v30  ;;  %v1460_v30 = vmul.f32 1.442695, %v1444_v46 }
 0x34e   : > { %v1625_v13 = vpack.c.bf16 %v3014_v2, %v3855_v49  ;;  %v1507_v53 = vadd.f32 %v3014_v2, %v3012_v58  ;;  %v1447_v49 = vsub.f32 %v3778_v0, %v3786_v33  ;;  %v2820_v2 = vld [vmem:[%s4338_s1 + $0xb8] sm:$0xff] }
 0x34f   : > { %3015 = vpow2.f32 %v1460_v30 }
 0x350   : > { %v1466_v52 = vmul.f32 1.442695, %v1447_v49 }
 0x352   : > { %1499 = vadd.xlane.f32.xlu0 %v1498_v35  ;;  %3017 = vpow2.f32 %v1466_v52 }
 0x353   : > { %1641 = vmatpush.bf16.xpose.msra.mxu2 %v1624_v20 }
 0x354   : > { %1690 = vmatpush.bf16.xpose.msra.mxu3 %v1625_v13 }
 0x355   : > { %v3926_v1 = vpop.eup %3015 }
 0x356   : > { %2748 = vmatmul.msk.bf16.gmra.mxu0 %vm570_vm8, %v2818_v21  ;;  %2772 = vmatmul.msk.bf16.gmra.mxu1 %vm570_vm8, %v2818_v21 }
 0x358   : > { %v3934_v8 = vpop.eup %3017 }
 0x35a   : > { %1508 = vadd.xlane.f32.xlu0 %v1507_v53 }
 0x35b   : > { %1642 = vmatpush.bf16.xpose.msra.mxu2 %v1622_v40 }
 0x35c   : > { %1691 = vmatpush.bf16.xpose.msra.mxu3 %v1623_v55 }
 0x362   : > { %1517 = vadd.xlane.f32.xlu0 %v3832_v23 }
 0x36a   : > { %1526 = vadd.xlane.f32.xlu0 %v3821_v6  ;;  %v2819_v6 = vld [vmem:[%s4338_s1 + $0xb0] sm:$0xff] }
 0x36b   : > { %2749 = vmatmul.msk.bf16.gmra.mxu0 %vm570_vm8, %v2819_v6  ;;  %2773 = vmatmul.msk.bf16.gmra.mxu1 %vm570_vm8, %v2819_v6 }
 0x372   : > { %1535 = vadd.xlane.f32.xlu0 %v3805_v29 }
 0x37b   : > { %2750 = vmatmul.msk.bf16.gmra.mxu0 %vm570_vm8, %v2820_v2  ;;  %2774 = vmatmul.msk.bf16.gmra.mxu1 %vm570_vm8, %v2820_v2 }
 0x37f   : > { %v739_v23 = vpop.f32.mrf.mxu0  ;;  %v868_v29 = vpop.f32.mrf.mxu1 }
 0x386   : > { %1815 = vperm.xlu0 %2866, %v3926_v1  }
 0x387   : > { %v741_v45 = vpop.f32.mrf.mxu0  ;;  %v870_v43 = vpop.f32.mrf.mxu1 }
 0x388   : > { %v1604_v5 = vpack.c.bf16 %v741_v45, %v739_v23  ;;  %v1605_v58 = vpack.c.bf16 %v870_v43, %v868_v29 }
 0x38d   : > { %v3971_v43 = vpop.permute.xlu2 %1818 }
 0x38e   : > { %1824 = vperm.xlu0 %2866, %v3934_v8  }
 0x391   : > { %v1271_v0 = vpop.permute.xlu1 %1270  ;;  %v744_v51 = vpop.f32.mrf.mxu0 }
 0x392   : > { %v1348_v33 = vsub.f32 %v3521_v4, %v1271_v0  ;;  %v1349_v22 = vsub.f32 %v3523_v12, %v1271_v0  ;;  %v873_v4 = vpop.f32.mrf.mxu1 }
 0x394   : > { %v1380_v46 = vmul.f32 1.442695, %v1348_v33  ;;  %v1382_v60 = vmul.f32 1.442695, %v1349_v22 }
 0x396   : > { %3019 = vpow2.f32 %v1380_v46 }
 0x397   : > { %3021 = vpow2.f32 %v1382_v60 }
 0x399   : > { %v3969_v45 = vpop.permute.xlu1 %1821 }
 0x39a   : > { %v1276_v17 = vpop.permute.xlu0 %1275 }
 0x39b   : > { %v1350_v48 = vsub.f32 %v3531_v10, %v1276_v17  ;;  %v1351_v57 = vsub.f32 %v3533_v11, %v1276_v17  ;;  %v746_v10 = vpop.f32.mrf.mxu0  ;;  %v875_v11 = vpop.f32.mrf.mxu1 }
 0x39c   : > { %v3020_v25 = vpop.eup %3019 }
 0x39d   : > { %v3022_v50 = vpop.eup %3021  ;;  %v1384_v14 = vmul.f32 1.442695, %v1350_v48  ;;  %v1386_v3 = vmul.f32 1.442695, %v1351_v57 }
 0x39e   : > { %v1492_v62 = vadd.f32 %v3022_v50, %v3020_v25 }
 0x39f   : > { %3023 = vpow2.f32 %v1384_v14 }
 0x3a0   : > { %3025 = vpow2.f32 %v1386_v3  ;;  %1493 = vadd.xlane.f32.xlu2 %v1492_v62 }
 0x3a1   : > { %v3979_v3 = vpop.permute.xlu1 %1827 }
 0x3a5   : > { %v3024_v12 = vpop.eup %3023 }
 0x3a6   : > { %v3026_v42 = vpop.eup %3025  ;;  %v1620_v44 = vpack.c.bf16 %v3024_v12, %v3020_v25  ;;  %v1540_v25 = vld [vmem:[%s4344_s7] sm:$0xff] }
 0x3a7   : > { %v1495_v18 = vadd.f32 %v3026_v42, %v3024_v12  ;;  %v1621_v19 = vpack.c.bf16 %v3026_v42, %v3022_v50  ;;  %v1556_v50 = vmul.f32 %v3926_v1, %v1540_v25  ;;  %v1451_v1 = vsub.f32 %v3783_v38, %v3789_v32  ;;  %v1544_v32 = vld [vmem:[%s4344_s7 + $0x20] sm:$0xff] }
 0x3a8   : > { %1502 = vadd.xlane.f32.xlu2 %v3891_v63  ;;  %1643 = vmatpush.bf16.xpose.msra.mxu2 %v1620_v44  ;;  %v1543_v44 = vld [vmem:[%s4344_s7 + $0x18] sm:$0xff] }
 0x3a9   : > { %1496 = vadd.xlane.f32.xlu1 %v1495_v18  ;;  %1692 = vmatpush.bf16.xpose.msra.mxu3 %v1621_v19  ;;  %v1541_v19 = vld [vmem:[%s4344_s7 + $0x8] sm:$0xff] }
 0x3af   : > { %1644 = vmatmul.bf16.vlgmr.msra.gmra.mxu2 %v1604_v5  ;;  %v1557_v5 = vmul.f32 %v3888_v61, %v1541_v19 }
 0x3b0   : > { %2191 = vmatpush.bf16.msrb.mxu2 %v3426_v26  ;;  %1693 = vmatmul.bf16.vlgmr.msra.gmra.mxu3 %v1605_v58  ;;  %v749_v26 = vpop.f32.mrf.mxu0 }
 0x3b1   : > { %2210 = vmatpush.bf16.msrb.mxu3 %v3428_v27  ;;  %1511 = vadd.xlane.f32.xlu2 %v3886_v24  ;;  %v878_v27 = vpop.f32.mrf.mxu1 }
 0x3b2   : > { %1505 = vadd.xlane.f32.xlu1 %v3864_v16 }
 0x3b4   : > { %2192 = vmatpush.bf16.msrb.mxu2 %v3433_v31  ;;  %v1606_v31 = vpack.c.bf16 %v746_v10, %v744_v51  ;;  %v1559_v10 = vmul.f32 %v3934_v8, %v1543_v44  ;;  %v1560_v8 = vmul.f32 %v3881_v54, %v1544_v32 }
 0x3b5   : > { %2211 = vmatpush.bf16.msrb.mxu3 %v3439_v37  ;;  %v1607_v37 = vpack.c.bf16 %v875_v11, %v873_v4 }
 0x3b8   : > { %2265 = vmatpush.bf16.msra.mxu2 %v3504_v7  ;;  %v751_v24 = vpop.f32.mrf.mxu0 }
 0x3b9   : > { %2284 = vmatpush.bf16.msra.mxu3 %v3506_v9  ;;  %1523 = vadd.xlane.f32.xlu2 %v3817_v34  ;;  %v880_v16 = vpop.f32.mrf.mxu1  ;;  %v1608_v63 = vpack.c.bf16 %v751_v24, %v749_v26  ;;  %v4398_v24 = vld [vmem:[#allocation31_spill] sm:$0xff] }
 0x3ba   : > { %1514 = vadd.xlane.f32.xlu1 %v3907_v47 }
 0x3bc   : > { %2266 = vmatpush.bf16.msra.mxu2 %v3511_v56  ;;  %v1609_v56 = vpack.c.bf16 %v880_v16, %v878_v27 }
 0x3bd   : > { %2285 = vmatpush.bf16.msra.mxu3 %v3517_v15  ;;  %v1542_v15 = vld [vmem:[%s4344_s7 + $0x10] sm:$0xff] }
 0x3be   : > { %v1558_v35 = vmul.f32 %v3873_v36, %v1542_v15 }
 0x3bf   : > { %1649 = vmatmul.bf16.gmra.mxu2 %v1606_v31 }
 0x3c0   : > { %1698 = vmatmul.bf16.gmra.mxu3 %v1607_v37  ;;  %v754_v7 = vpop.f32.mrf.mxu0  ;;  %v4397_v37 = vld [vmem:[#allocation32_spill] sm:$0xff] }
 0x3c1   : > { %v883_v9 = vpop.f32.mrf.mxu1  ;;  %v1450_v16 = vsub.f32 %v4398_v24, %v4397_v37  ;;  %v4400_v37 = vld [vmem:[#allocation18_spill] sm:$0xff] }
 0x3c2   : > { %1520 = vadd.xlane.f32.xlu1 %v3838_v59 }
 0x3c3   : > { %v1472_v38 = vmul.f32 1.442695, %v1450_v16 }
 0x3c5   : > { %v1500_v34 = vpop.xlane.xlu0 %1499 }
 0x3c6   : > { %v1574_v13 = vadd.f32 %v1558_v35, %v1500_v34 }
 0x3c8   : > { %v756_v47 = vpop.f32.mrf.mxu0  ;;  %3027 = vrcp.f32 %v1574_v13 }
 0x3c9   : > { %v885_v20 = vpop.f32.mrf.mxu1  ;;  %v1610_v53 = vpack.c.bf16 %v756_v47, %v754_v7  ;;  %v1474_v7 = vmul.f32 1.442695, %v1451_v1 }
 0x3ca   : > { %1529 = vadd.xlane.f32.xlu1 %v3801_v28  ;;  %v1611_v55 = vpack.c.bf16 %v885_v20, %v883_v9  ;;  %v1862_v9 = vlaneseq }
 0x3cc   : > { %v3998_v61 = vand.u32 127, %v1862_v9  ;;  %v1784_v9 = vld [vmem:[%s4345_s8 + $0x10] sm:$0xff] }
 0x3cd   : > { %v3965_v33 = vpop.xlane.xlu0 %1508 }
 0x3ce   : > { %v3028_v28 = vpop.eup %3027  ;;  %v4002_v13 = vadd.s32 4294967288, %v3998_v61 }
 0x3cf   : > { %1654 = vmatmul.bf16.gmra.mxu2 %v1608_v63  ;;  %v1966_v21 = vmul.f32 0.17677669, %v3028_v28 }
 0x3d0   : > { %1703 = vmatmul.bf16.gmra.mxu3 %v1609_v56  ;;  %v759_v59 = vpop.f32.mrf.mxu0 }
 0x3d1   : > { %v888_v40 = vpop.f32.mrf.mxu1 }
 0x3d5   : > { %v3967_v60 = vpop.xlane.xlu0 %1517 }
 0x3d8   : > { %v761_v30 = vpop.f32.mrf.mxu0 }
 0x3d9   : > { %v890_v49 = vpop.f32.mrf.mxu1  ;;  %v1612_v52 = vpack.c.bf16 %v761_v30, %v759_v59 }
 0x3da   : > { %v1613_v6 = vpack.c.bf16 %v890_v49, %v888_v40  ;;  %v4009_v40 = vadd.s32 4294967272, %v3998_v61 }
 0x3dd   : > { %v3973_v57 = vpop.xlane.xlu0 %1526 }
 0x3df   : > { %1659 = vmatmul.bf16.gmra.mxu2 %v1610_v53  ;;  %v1547_v53 = vld [vmem:[%s4344_s7 + $0x38] sm:$0xff] }
 0x3e0   : > { %1708 = vmatmul.bf16.gmra.mxu3 %v1611_v55  ;;  %v764_v23 = vpop.f32.mrf.mxu0  ;;  %v4012_v55 = vadd.s32 4294967280, %v3998_v61 }
 0x3e1   : > { %v893_v29 = vpop.f32.mrf.mxu1 }
 0x3e3   : > { %2003 = vperm.xlu1 %2868, %v1966_v21   ;;  %v1866_v21 = vperm.slane %v3971_v43, %v4002_v13 }
 0x3e5   : > { %v3984_v18 = vpop.xlane.xlu0 %1535 }
 0x3e8   : > { %v766_v36 = vpop.f32.mrf.mxu0 }
 0x3e9   : > { %v895_v0 = vpop.f32.mrf.mxu1  ;;  %v1614_v22 = vpack.c.bf16 %v766_v36, %v764_v23 }
 0x3ea   : > { %v1615_v46 = vpack.c.bf16 %v895_v0, %v893_v29 }
 0x3ef   : > { %1664 = vmatmul.bf16.gmra.mxu2 %v1612_v52  ;;  %v1546_v52 = vld [vmem:[%s4344_s7 + $0x30] sm:$0xff] }
 0x3f0   : > { %1713 = vmatmul.bf16.gmra.mxu3 %v1613_v6  ;;  %v769_v48 = vpop.f32.mrf.mxu0 }
 0x3f1   : > { %v898_v17 = vpop.f32.mrf.mxu1 }
 0x3f8   : > { %v771_v51 = vpop.f32.mrf.mxu0  ;;  %v1816_v63 = vpop.permute.xlu0 %1815 }
 0x3f9   : > { %v900_v4 = vpop.f32.mrf.mxu1  ;;  %v1616_v12 = vpack.c.bf16 %v771_v51, %v769_v48  ;;  %v1864_v54 = vperm.slane %v1816_v63, %v3998_v61  ;;  %v1782_v51 = vld [vmem:[%s4345_s8] sm:$0xff] }
 0x3fa   : > { %v1617_v42 = vpack.c.bf16 %v900_v4, %v898_v17 }
 0x3fb   : > { %v1868_v36 = vsel %vm1867_vm9, %v1866_v21, %v1864_v54  ;;  %v4405_v54 = vld [vmem:[#allocation30_spill] sm:$0xff] }
 0x3ff   : > { %1669 = vmatmul.bf16.gmra.mxu2 %v1614_v22 }
 0x400   : > { %1718 = vmatmul.bf16.gmra.mxu3 %v1615_v46  ;;  %v1825_v28 = vpop.permute.xlu0 %1824  ;;  %v774_v23 = vpop.f32.mrf.mxu0  ;;  %v1870_v46 = vperm.slane %v3969_v45, %v4012_v55 }
 0x401   : > { %v1874_v0 = vperm.slane %v1825_v28, %v4009_v40  ;;  %v903_v25 = vpop.f32.mrf.mxu1  ;;  %v4406_v28 = vld [vmem:[#allocation29_spill] sm:$0xff] }
 0x402   : > { %v1449_v21 = vsub.f32 %v4406_v28, %v4405_v54 }
 0x408   : > { %v776_v44 = vpop.f32.mrf.mxu0 }
 0x409   : > { %v1618_v1 = vpack.c.bf16 %v776_v44, %v774_v23 }
 0x40f   : > { %1674 = vmatmul.bf16.gmra.mxu2 %v1616_v12 }
 0x410   : > { %1723 = vmatmul.bf16.gmra.mxu3 %v1617_v42 }
 0x413   : > { %v1494_v14 = vpop.xlane.xlu2 %1493 }
 0x414   : > { %v1572_v62 = vadd.f32 %v1556_v50, %v1494_v14  ;;  %v1872_v50 = vsel %vm1871_vm10, %v1870_v46, %v1868_v36 }
 0x415   : > { %v4025_v14 = vsel %vm1875_vm11, %v1874_v0, %v1872_v50 }
 0x416   : > { %3029 = vrcp.f32 %v1572_v62  ;;  %v1932_v42 = vmul.f32 %v4025_v14, %v1782_v51 }
 0x41b   : > { %v1503_v11 = vpop.xlane.xlu2 %1502 }
 0x41c   : > { %v3030_v58 = vpop.eup %3029  ;;  %v1575_v2 = vadd.f32 %v1559_v10, %v1503_v11  ;;  %v1497_v26 = vpop.xlane.xlu1 %1496 }
 0x41d   : > { %v1964_v27 = vmul.f32 0.17677669, %v3030_v58  ;;  %v1573_v31 = vadd.f32 %v1557_v5, %v1497_v26  ;;  %v905_v5 = vpop.f32.mrf.mxu1 }
 0x41e   : > { %3031 = vrcp.f32 %v1575_v2  ;;  %v1619_v58 = vpack.c.bf16 %v905_v5, %v903_v25 }
 0x41f   : > { %3033 = vrcp.f32 %v1573_v31  ;;  %1997 = vperm.xlu2 %2867, %v1964_v27   ;;  %1679 = vmatmul.bf16.gmra.mxu2 %v1618_v1  ;;  %v4399_v31 = vld [vmem:[#allocation17_spill] sm:$0xff] }
 0x420   : > { %3035 = vpow2.f32 %v1474_v7  ;;  %1728 = vmatmul.bf16.gmra.mxu3 %v1619_v58  ;;  %v4401_v24 = vsub.f32 %v4399_v31, %v4400_v37  ;;  %v4410_v58 = vld [vmem:[#allocation19_spill] sm:$0xff] }
 0x421   : > { %3037 = vpow2.f32 %v1472_v38 }
 0x422   : > { %v1480_v16 = vmul.f32 1.442695, %v4401_v24  ;;  %v1548_v24 = vld [vmem:[%s4344_s7 + $0x40] sm:$0xff] }
 0x424   : > { %v3032_v56 = vpop.eup %3031  ;;  %v1512_v43 = vpop.xlane.xlu2 %1511 }
 0x425   : > { %v1506_v15 = vpop.xlane.xlu1 %1505  ;;  %v3034_v34 = vpop.eup %3033  ;;  %v1967_v47 = vmul.f32 0.17677669, %v3032_v56 }
 0x426   : > { %v1576_v35 = vadd.f32 %v1560_v8, %v1506_v15  ;;  %v1965_v20 = vmul.f32 0.17677669, %v3034_v34  ;;  %v3036_v59 = vpop.eup %3035  ;;  %v1934_v8 = vmul.f32 %v4025_v14, %v1784_v9  ;;  %v4402_v34 = vld [vmem:[#allocation15_spill] sm:$0xff]  ;;  %v4413_v9 = vld [vmem:[#allocation25_spill] sm:$0xff] }
 0x427   : > { %2006 = vperm.xlu2 %2867, %v1967_v47   ;;  %v1563_v30 = vmul.f32 %v3036_v59, %v1547_v53  ;;  %v3038_v49 = vpop.eup %3037  ;;  %v4403_v47 = vld [vmem:[#allocation16_spill] sm:$0xff] }
 0x428   : > { %3039 = vrcp.f32 %v1576_v35  ;;  %2000 = vperm.xlu0 %2866, %v1965_v20   ;;  %v1562_v48 = vmul.f32 %v3038_v49, %v1546_v52  ;;  %v4404_v35 = vsub.f32 %v4402_v34, %v4403_v47  ;;  %v1549_v52 = vld [vmem:[%s4344_s7 + $0x48] sm:$0xff] }
 0x42a   : > { %v1578_v62 = vadd.f32 %v1562_v48, %v1512_v43  ;;  %v1478_v20 = vmul.f32 1.442695, %v4404_v35 }
 0x42d   : > { %v1515_v6 = vpop.xlane.xlu1 %1514 }
 0x42e   : > { %v3040_v29 = vpop.eup %3039  ;;  %v1579_v22 = vadd.f32 %v1563_v30, %v1515_v6 }
 0x42f   : > { %v1968_v17 = vmul.f32 0.17677669, %v3040_v29 }
 0x430   : > { %3041 = vrcp.f32 %v1579_v22  ;;  %1833 = vperm.xlu0 %2866, %v3038_v49   ;;  %v1470_v49 = vmul.f32 1.442695, %v1449_v21 }
 0x431   : > { %2009 = vperm.xlu1 %2868, %v1968_v17   ;;  %3043 = vrcp.f32 %v1578_v62 }
 0x432   : > { %v1645_v4 = vpop.f32.mrf.mxu2  ;;  %3045 = vpow2.f32 %v1480_v16 }
 0x433   : > { %v1694_v45 = vpop.f32.mrf.mxu3  ;;  %3047 = vpow2.f32 %v1478_v20  ;;  %v1551_v20 = vld [vmem:[%s4344_s7 + $0x58] sm:$0xff] }
 0x434   : > { %v1695_v12 = vadd.f32 %v1694_v45, %v1645_v4  ;;  %3049 = vpow2.f32 %v1470_v49  ;;  %v4407_v45 = vld [vmem:[#allocation13_spill] sm:$0xff] }
 0x435   : > { %v1521_v29 = vpop.xlane.xlu1 %1520 }
 0x436   : > { %v3042_v19 = vpop.eup %3041  ;;  %v4031_v11 = vadd.f32 %v1932_v42, %v1695_v12  ;;  %v4408_v12 = vld [vmem:[#allocation14_spill] sm:$0xff] }
 0x437   : > { %v1971_v10 = vmul.f32 0.17677669, %v3042_v19  ;;  %v3044_v26 = vpop.eup %3043  ;;  %v4409_v42 = vsub.f32 %v4407_v45, %v4408_v12 }
 0x438   : > { %1836 = vperm.xlu0 %2866, %v3036_v59   ;;  %v1970_v7 = vmul.f32 0.17677669, %v3044_v26  ;;  %v4046_v15 = vpop.eup %3045  ;;  %v4411_v26 = vld [vmem:[#allocation20_spill] sm:$0xff] }
 0x439   : > { %2018 = vperm.xlu1 %2868, %v1971_v10   ;;  %v3048_v30 = vpop.eup %3047  ;;  %v1476_v44 = vmul.f32 1.442695, %v4409_v42 }
 0x43a   : > { %v4033_v2 = vpop.f32.mrf.mxu2  ;;  %v1565_v36 = vmul.f32 %v3048_v30, %v1549_v52  ;;  %v3050_v43 = vpop.eup %3049 }
 0x43b   : > { %v4035_v27 = vpop.f32.mrf.mxu3 }
 0x43c   : > { %v1581_v0 = vadd.f32 %v1565_v36, %v1521_v29 }
 0x43e   : > { %3051 = vrcp.f32 %v1581_v0 }
 0x440   : > { %2015 = vperm.xlu0 %2866, %v1970_v7  }
 0x442   : > { %v1650_v63 = vpop.f32.mrf.mxu2 }
 0x443   : > { %v1699_v32 = vpop.f32.mrf.mxu3 }
 0x444   : > { %v1700_v38 = vadd.f32 %v1699_v32, %v1650_v63  ;;  %v3052_v25 = vpop.eup %3051  ;;  %v4414_v63 = vld [vmem:[#allocation26_spill] sm:$0xff] }
 0x445   : > { %v1973_v4 = vmul.f32 0.17677669, %v3052_v25  ;;  %v4415_v32 = vsub.f32 %v4413_v9, %v4414_v63  ;;  %v4420_v25 = vld [vmem:[#allocation24_spill] sm:$0xff] }
 0x446   : > { %v4044_v56 = vadd.f32 %v1934_v8, %v1700_v38 }
 0x447   : > { %v1488_v38 = vmul.f32 1.442695, %v4415_v32 }
 0x448   : > { %1845 = vperm.xlu0 %2866, %v4046_v15  }
 0x44a   : > { %v4052_v59 = vpop.f32.mrf.mxu2 }
 0x44b   : > { %v4054_v53 = vpop.f32.mrf.mxu3 }
 0x44c   : > { %v1702_v9 = vadd.f32 %v4054_v53, %v4052_v59 }
 0x450   : > { %1532 = vadd.xlane.f32.xlu2 %v3811_v41  ;;  %v1545_v41 = vld [vmem:[%s4344_s7 + $0x28] sm:$0xff] }
 0x451   : > { %v1561_v48 = vmul.f32 %v3050_v43, %v1545_v41  ;;  %v1524_v41 = vpop.xlane.xlu2 %1523 }
 0x452   : > { %v1655_v6 = vpop.f32.mrf.mxu2 }
 0x453   : > { %v1704_v23 = vpop.f32.mrf.mxu3  ;;  %v1577_v50 = vadd.f32 %v1561_v48, %v3965_v33  ;;  %v4412_v33 = vsub.f32 %v4410_v58, %v4411_v26  ;;  %v4419_v48 = vld [vmem:[#allocation23_spill] sm:$0xff]  ;;  %v1530_v58 = vpop.xlane.xlu1 %1529 }
 0x454   : > { %v1705_v52 = vadd.f32 %v1704_v23, %v1655_v6 }
 0x455   : > { %3053 = vrcp.f32 %v1577_v50  ;;  %v1482_v31 = vmul.f32 1.442695, %v4412_v33  ;;  %v4421_v50 = vsub.f32 %v4419_v48, %v4420_v25 }
 0x456   : > { %3055 = vpow2.f32 %v1476_v44 }
 0x457   : > { %3057 = vpow2.f32 %v1482_v31 }
 0x458   : > { %3059 = vpow2.f32 %v1488_v38 }
 0x45a   : > { %v1657_v22 = vpop.f32.mrf.mxu2 }
 0x45b   : > { %v1706_v46 = vpop.f32.mrf.mxu3  ;;  %v3054_v1 = vpop.eup %3053 }
 0x45c   : > { %v1707_v17 = vadd.f32 %v1706_v46, %v1657_v22  ;;  %v3056_v37 = vpop.eup %3055  ;;  %v4416_v46 = vld [vmem:[#allocation21_spill] sm:$0xff] }
 0x45d   : > { %v1564_v16 = vmul.f32 %v3056_v37, %v1548_v24  ;;  %v3058_v35 = vpop.eup %3057  ;;  %v1785_v24 = vld [vmem:[%s4345_s8 + $0x18] sm:$0xff] }
 0x45e   : > { %1740 = vrot.lane.b32.xlu0 %v1707_v17, %s3151_s22  ;;  %v1567_v54 = vmul.f32 %v3058_v35, %v1551_v20 }
 0x45f   : > { %v1580_v34 = vadd.f32 %v1564_v16, %v3967_v60  ;;  %v4087_v60 = vpop.eup %3059  ;;  %v2004_v16 = vpop.permute.xlu1 %2003 }
 0x460   : > { %v1583_v49 = vadd.f32 %v1567_v54, %v3973_v57 }
 0x461   : > { %3061 = vrcp.f32 %v1580_v34 }
 0x462   : > { %v1660_v62 = vpop.f32.mrf.mxu2  ;;  %3063 = vrcp.f32 %v1583_v49 }
 0x463   : > { %1538 = vadd.xlane.f32.xlu1 %v3823_v39  ;;  %v1709_v51 = vpop.f32.mrf.mxu3  ;;  %v1969_v39 = vmul.f32 0.17677669, %v3054_v1 }
 0x466   : > { %2024 = vperm.xlu0 %2866, %v1973_v4   ;;  %v1486_v4 = vmul.f32 1.442695, %v4421_v50 }
 0x467   : > { %v3062_v29 = vpop.eup %3061 }
 0x468   : > { %1830 = vperm.xlu2 %2867, %v3050_v43   ;;  %v1972_v36 = vmul.f32 0.17677669, %v3062_v29  ;;  %v4417_v43 = vld [vmem:[#allocation22_spill] sm:$0xff]  ;;  %v3064_v23 = vpop.eup %3063 }
 0x469   : > { %v4418_v57 = vsub.f32 %v4416_v46, %v4417_v43  ;;  %v1975_v45 = vmul.f32 0.17677669, %v3064_v23  ;;  %v1554_v43 = vld [vmem:[%s4344_s7 + $0x70] sm:$0xff] }
 0x46a   : > { %v1662_v19 = vpop.f32.mrf.mxu2 }
 0x46b   : > { %v1711_v10 = vpop.f32.mrf.mxu3  ;;  %v1484_v6 = vmul.f32 1.442695, %v4418_v57 }
 0x46c   : > { %v1712_v5 = vadd.f32 %v1711_v10, %v1662_v19  ;;  %v1710_v19 = vadd.f32 %v1709_v51, %v1660_v62 }
 0x46d   : > { %3065 = vpow2.f32 %v1484_v6 }
 0x46e   : > { %1744 = vrot.lane.b32.xlu0 %v1712_v5, %s3151_s22  ;;  %3067 = vpow2.f32 %v1486_v4  ;;  %v1570_v4 = vmul.f32 %v4087_v60, %v1554_v43 }
 0x470   : > { %2012 = vperm.xlu2 %2867, %v1969_v39  }
 0x472   : > { %v1665_v7 = vpop.f32.mrf.mxu2 }
 0x473   : > { %v1714_v8 = vpop.f32.mrf.mxu3  ;;  %v3066_v10 = vpop.eup %3065 }
 0x474   : > { %v1715_v47 = vadd.f32 %v1714_v8, %v1665_v7  ;;  %v4106_v26 = vpop.eup %3067  ;;  %v1697_v7 = vadd.f32 %v4035_v27, %v4033_v2 }
 0x476   : > { %1754 = vrot.lane.b32.xlu0 %v1715_v47, %s3152_s25  ;;  %v1935_v47 = vmul.f32 %v4025_v14, %v1785_v24 }
 0x478   : > { %1842 = vperm.xlu2 %2867, %v3048_v30   ;;  %v1550_v30 = vld [vmem:[%s4344_s7 + $0x50] sm:$0xff]  ;;  %v1951_v54 = vadd.f32 %v1935_v47, %v1702_v9  ;;  %v2462_v9 = vld [vmem:[%s4340_s3] sm:$0xf] }
 0x479   : > { %v1566_v17 = vmul.f32 %v4046_v15, %v1550_v30  ;;  %v1552_v15 = vld [vmem:[%s4344_s7 + $0x60] sm:$0xff]  ;;  %v1998_v5 = vpop.permute.xlu2 %1997 }
 0x47a   : > { %v1667_v28 = vpop.f32.mrf.mxu2  ;;  %v1568_v33 = vmul.f32 %v3066_v10, %v1552_v15  ;;  %v2044_v38 = vperm.slane %v1998_v5, %v3998_v61 }
 0x47b   : > { %v1716_v21 = vpop.f32.mrf.mxu3  ;;  %v1582_v12 = vadd.f32 %v1566_v17, %v1524_v41  ;;  %v4422_v17 = vld [vmem:[#allocation27_spill] sm:$0xff] }
 0x47c   : > { %1839 = vperm.xlu1 %2868, %v3056_v37   ;;  %v1584_v62 = vadd.f32 %v1568_v33, %v1530_v58  ;;  %v1783_v37 = vld [vmem:[%s4345_s8 + $0x8] sm:$0xff]  ;;  %v1717_v20 = vadd.f32 %v1716_v21, %v1667_v28 }
 0x47d   : > { %3069 = vrcp.f32 %v1582_v12  ;;  %v1933_v34 = vmul.f32 %v4025_v14, %v1783_v37  ;;  %v4425_v12 = vld [vmem:[#allocation5_spill] sm:$0xff] }
 0x47e   : > { %1857 = vperm.xlu0 %2866, %v4087_v60   ;;  %3071 = vrcp.f32 %v1584_v62 }
 0x47f   : > { %v1949_v53 = vadd.f32 %v1933_v34, %v1697_v7 }
 0x480   : > { %1738 = vrot.lane.b32.xlu2 %v1705_v52, %s3151_s22 }
 0x481   : > { %v2007_v63 = vpop.permute.xlu2 %2006 }
 0x482   : > { %v1670_v0 = vpop.f32.mrf.mxu2  ;;  %v2049_v2 = vperm.slane %v2007_v63, %v4009_v40 }
 0x483   : > { %v1719_v22 = vpop.f32.mrf.mxu3  ;;  %v3070_v31 = vpop.eup %3069 }
 0x484   : > { %2021 = vperm.xlu1 %2868, %v1972_v36   ;;  %v1974_v51 = vmul.f32 0.17677669, %v3070_v31  ;;  %v1720_v39 = vadd.f32 %v1719_v22, %v1670_v0  ;;  %v3072_v59 = vpop.eup %3071 }
 0x485   : > { %v1976_v28 = vmul.f32 0.17677669, %v3072_v59 }
 0x488   : > { %1848 = vperm.xlu2 %2867, %v3058_v35   ;;  %v2047_v35 = vperm.slane %v2004_v16, %v4012_v55 }
 0x48a   : > { %v1672_v42 = vpop.f32.mrf.mxu2 }
 0x48b   : > { %v1721_v44 = vpop.f32.mrf.mxu3 }
 0x48c   : > { %2030 = vperm.xlu1 %2868, %v1975_v45   ;;  %v1722_v1 = vadd.f32 %v1721_v44, %v1672_v42  ;;  %v1586_v45 = vadd.f32 %v1570_v4, %v3984_v18  ;;  %v4426_v42 = vld [vmem:[#allocation6_spill] sm:$0xff]  ;;  %v4427_v44 = vld [vmem:[#allocation8_spill] sm:$0xff] }
 0x48e   : > { %1760 = vrot.lane.b32.xlu0 %v1722_v1, %s3152_s25 }
 0x490   : > { %1742 = vrot.lane.b32.xlu2 %v1710_v19, %s3151_s22  ;;  %v4428_v19 = vld [vmem:[#allocation7_spill] sm:$0xff] }
 0x492   : > { %v1675_v15 = vpop.f32.mrf.mxu2 }
 0x493   : > { %v1724_v60 = vpop.f32.mrf.mxu3 }
 0x494   : > { %1854 = vperm.xlu1 %2868, %v4106_v26  }
 0x498   : > { %2027 = vperm.xlu2 %2867, %v1974_v51   ;;  %v1553_v51 = vld [vmem:[%s4344_s7 + $0x68] sm:$0xff] }
 0x49a   : > { %v2001_v32 = vpop.permute.xlu0 %2000  ;;  %v1677_v18 = vpop.f32.mrf.mxu2 }
 0x49b   : > { %v2045_v8 = vperm.slane %v2001_v32, %v4002_v13  ;;  %v1726_v33 = vpop.f32.mrf.mxu3 }
 0x49c   : > { %1758 = vrot.lane.b32.xlu1 %v1720_v39, %s3152_s25  ;;  %v1727_v62 = vadd.f32 %v1726_v33, %v1677_v18  ;;  %v1569_v39 = vmul.f32 %v4106_v26, %v1553_v51 }
 0x49d   : > { %v2046_v27 = vsel %vm1867_vm9, %v2045_v8, %v2044_v38 }
 0x49e   : > { %v2048_v49 = vsel %vm1871_vm10, %v2047_v35, %v2046_v27 }
 0x49f   : > { %v2050_v52 = vsel %vm1875_vm11, %v2049_v2, %v2048_v49  ;;  %v1555_v2 = vld [vmem:[%s4344_s7 + $0x78] sm:$0xff]  ;;  %v1725_v49 = vadd.f32 %v1724_v60, %v1675_v15 }
 0x4a0   : > { %1756 = vrot.lane.b32.xlu2 %v1717_v20, %s3152_s25  ;;  %v2100_v29 = vmul.f32 %v2050_v52, %v4031_v11  ;;  %v2101_v36 = vmul.f32 %v2050_v52, %v1949_v53  ;;  %v2102_v14 = vmul.f32 %v2050_v52, %v4044_v56  ;;  %v2103_v0 = vmul.f32 %v2050_v52, %v1951_v54  ;;  %v4423_v11 = vld [vmem:[#allocation28_spill] sm:$0xff]  ;;  %s2628_s25 = sshll.u32 %s323_s26, 3 }
 0x4a1   : > { %v4424_v48 = vsub.f32 %v4422_v17, %v4423_v11  ;;  %v1877_v20 = vperm.slane %v3979_v3, %v3998_v61  ;;  %s325_s16 = scalar_lea.vmem [#allocation2], %s2628_s25  ;;  %s3105_s25 = scalar_lea.hbm %s4346_s9, 16 }
 0x4a2   : > { %v2116_v21 = vpack.c.bf16 %v2100_v29, %v2100_v29  ;;  %v2117_v22 = vpack.c.bf16 %v2101_v36, %v2101_v36  ;;  %v2118_v30 = vpack.c.bf16 %v2102_v14, %v2102_v14  ;;  %v2119_v46 = vpack.c.bf16 %v2103_v0, %v2103_v0  ;;  %v1834_v5 = vpop.permute.xlu0 %1833  ;;  %v1680_v34 = vpop.f32.mrf.mxu2  ;;  %s2562_s17 = sshll.u32 %s325_s16, 4  ;;  %p3107_p1 = scmp.lt.s32.totalorder %s3105_s25, %s3101_s24  ;;  %s2563_s17 = int_to_ptr.vmem [resolvable:$true] %s2562_s17 }
 0x4a3   : > { %v1490_v25 = vmul.f32 1.442695, %v4424_v48  ;;  %v2010_v37 = vpop.permute.xlu1 %2009  ;;  %v1729_v47 = vpop.f32.mrf.mxu3  ;;  %v1880_v53 = vperm.slane %v1834_v5, %v4012_v55 }
 0x4a4   : > { %2033 = vperm.xlu1 %2868, %v1976_v28   ;;  %v2152_v57 = vunpack.c.l.b16 %v2116_v21  ;;  %v2153_v6 = vunpack.c.l.b16 %v2117_v22  ;;  %v2154_v23 = vunpack.c.l.b16 %v2118_v30  ;;  %v2155_v41 = vunpack.c.l.b16 %v2119_v46  ;;  %v1787_v30 = vld [vmem:[%s4345_s8 + $0x28] sm:$0xff]  ;;  %p3108_p2 = por %p3107_p1, %p3106_p0 }
 0x4a5   : > { %3073 = vpow2.f32 %v1490_v25  ;;  %v2051_v0 = vperm.slane %v2010_v37, %v3998_v61  ;;  %v1730_v60 = vadd.f32 %v1729_v47, %v1680_v34  ;;  %v4431_v47 = vld [vmem:[#allocation11_spill] sm:$0xff] }
 0x4a6   : > { %v2156_v56 = vpack.c.b16 %v2153_v6, %v2152_v57  ;;  %v2157_v50 = vpack.c.b16 %v2155_v41, %v2154_v23  ;;  %3075 = vrcp.f32 %v1586_v45  ;;  %p3109_p3 = pnand %p3108_p2, %p3104_p13 }
 0x4a8   : > { %2777 = vmatmul.msk.bf16.vlgmr.msrb.gmra.mxu3 %vm2178_vm12, %v2156_v56  ;;  %1851 = vperm.xlu2 %2867, %v3066_v10  }
 0x4a9   : > { %2358 = vmatpush.bf16.msrb.mxu3 %v4425_v12  ;;  %2775 = vmatmul.msk.bf16.vlgmr.msrb.gmra.mxu2 %vm2178_vm12, %v2156_v56 }
 0x4aa   : > { %2339 = vmatpush.bf16.msrb.mxu2 %v4426_v42  ;;  %v1837_v31 = vpop.permute.xlu0 %1836  ;;  %v1682_v21 = vpop.f32.mrf.mxu2 }
 0x4ab   : > { %v3074_v1 = vpop.eup %3073  ;;  %v2019_v38 = vpop.permute.xlu1 %2018  ;;  %v1882_v3 = vperm.slane %v1837_v31, %v4009_v40 }
 0x4ac   : > { %v3076_v10 = vpop.eup %3075  ;;  %v1571_v54 = vmul.f32 %v3074_v1, %v1555_v2  ;;  %v1731_v22 = vpop.f32.mrf.mxu3  ;;  %v2056_v11 = vperm.slane %v2019_v38, %v4009_v40 }
 0x4ad   : > { %2359 = vmatpush.bf16.msrb.mxu3 %v4427_v44  ;;  %v1978_v58 = vmul.f32 0.17677669, %v3076_v10  ;;  %v1732_v23 = vadd.f32 %v1731_v22, %v1682_v21  ;;  %v1789_v10 = vld [vmem:[%s4345_s8 + $0x38] sm:$0xff] }
 0x4ae   : > { %2340 = vmatpush.bf16.msrb.mxu2 %v4428_v19 }
 0x4b0   : > { %1860 = vperm.xlu2 %2867, %v3074_v1  }
 0x4b2   : > { %v2016_v7 = vpop.permute.xlu0 %2015 }
 0x4b3   : > { %v2054_v57 = vperm.slane %v2016_v7, %v4012_v55  ;;  %v4429_v7 = vld [vmem:[#allocation9_spill] sm:$0xff] }
 0x4b8   : > { %2778 = vmatmul.msk.bf16.gmra.mxu3 %vm2178_vm12, %v2157_v50  ;;  %2039 = vperm.xlu2 %2867, %v1978_v58  }
 0x4b9   : > { %2776 = vmatmul.msk.bf16.gmra.mxu2 %vm2178_vm12, %v2157_v50  ;;  %v1786_v50 = vld [vmem:[%s4345_s8 + $0x20] sm:$0xff] }
 0x4ba   : > { %v4156_v35 = vpop.permute.xlu0 %1845 }
 0x4bb   : > { %v1887_v2 = vperm.slane %v4156_v35, %v4012_v55 }
 0x4c0   : > { %1772 = vrot.lane.b32.xlu2 %v1727_v62, %s3153_s28 }
 0x4c3   : > { %v1533_v24 = vpop.xlane.xlu2 %1532 }
 0x4c4   : > { %v1585_v16 = vadd.f32 %v1569_v39, %v1533_v24  ;;  %v2534_v24 = vld [vmem:[%s4342_s5] sm:$0xf] }
 0x4c6   : > { %3077 = vrcp.f32 %v1585_v16 }
 0x4c8   : > { %2465 = vperm.xlu2 %2867, %v2462_v9   ;;  %v4430_v9 = vld [vmem:[#allocation10_spill] sm:$0xff] }
 0x4cb   : > { %v1831_v63 = vpop.permute.xlu2 %1830 }
 0x4cc   : > { %v3078_v32 = vpop.eup %3077  ;;  %v1878_v26 = vperm.slane %v1831_v63, %v4002_v13  ;;  %v1788_v63 = vld [vmem:[%s4345_s8 + $0x30] sm:$0xff] }
 0x4cd   : > { %v1977_v8 = vmul.f32 0.17677669, %v3078_v32 }
 0x4ce   : > { %v1879_v27 = vsel %vm1867_vm9, %v1878_v26, %v1877_v20  ;;  %v4432_v26 = vld [vmem:[#allocation12_spill] sm:$0xff] }
 0x4cf   : > { %2036 = vperm.xlu0 %2866, %v1977_v8   ;;  %v1881_v36 = vsel %vm1871_vm10, %v1880_v53, %v1879_v27 }
 0x4d0   : > { %v1741_v28 = vpop.permute.xlu0 %1740  ;;  %v1883_v46 = vsel %vm1875_vm11, %v1882_v3, %v1881_v36 }
 0x4d1   : > { %v1937_v41 = vmul.f32 %v1883_v46, %v1787_v30  ;;  %v1936_v12 = vmul.f32 %v1883_v46, %v1786_v50  ;;  %v1939_v62 = vmul.f32 %v1883_v46, %v1789_v10  ;;  %v1938_v8 = vmul.f32 %v1883_v46, %v1788_v63 }
 0x4d3   : > { %v2013_v59 = vpop.permute.xlu2 %2012  ;;  %v1953_v4 = vadd.f32 %v1937_v41, %v1741_v28 }
 0x4d4   : > { %v2052_v52 = vperm.slane %v2013_v59, %v4002_v13 }
 0x4d6   : > { %v1539_v29 = vpop.xlane.xlu1 %1538  ;;  %v2053_v43 = vsel %vm1867_vm9, %v2052_v52, %v2051_v0  ;;  %v1790_v0 = vld [vmem:[%s4345_s8 + $0x40] sm:$0xff] }
 0x4d7   : > { %v1587_v14 = vadd.f32 %v1571_v54, %v1539_v29  ;;  %1770 = vrot.lane.b32.xlu0 %v1725_v49, %s3153_s28  ;;  %v2055_v17 = vsel %vm1871_vm10, %v2054_v57, %v2053_v43 }
 0x4d8   : > { %v2057_v56 = vsel %vm1875_vm11, %v2056_v11, %v2055_v17  ;;  %v2025_v45 = vpop.permute.xlu0 %2024  ;;  %v1791_v17 = vld [vmem:[%s4345_s8 + $0x48] sm:$0xff] }
 0x4d9   : > { %3079 = vrcp.f32 %v1587_v14  ;;  %v2105_v42 = vmul.f32 %v2057_v56, %v1953_v4  ;;  %v2059_v21 = vperm.slane %v2025_v45, %v4002_v13 }
 0x4db   : > { %v1843_v6 = vpop.permute.xlu2 %1842  ;;  %v2121_v15 = vpack.c.bf16 %v2105_v42, %v2105_v42 }
 0x4dc   : > { %v1885_v32 = vperm.slane %v1843_v6, %v4002_v13 }
 0x4dd   : > { %v2228_v18 = vunpack.c.l.b16 %v2121_v15  ;;  %v1792_v15 = vld [vmem:[%s4345_s8 + $0x50] sm:$0xff] }
 0x4df   : > { %v3080_v48 = vpop.eup %3079  ;;  %1776 = vrot.lane.b32.xlu0 %v1732_v23, %s3153_s28 }
 0x4e0   : > { %v1979_v25 = vmul.f32 0.17677669, %v3080_v48  ;;  %v1745_v33 = vpop.permute.xlu0 %1744 }
 0x4e1   : > { %v1955_v37 = vadd.f32 %v1939_v62, %v1745_v33 }
 0x4e2   : > { %2042 = vperm.xlu1 %2868, %v1979_v25  }
 0x4e3   : > { %v1739_v44 = vpop.permute.xlu2 %1738  ;;  %v2107_v38 = vmul.f32 %v2057_v56, %v1955_v37 }
 0x4e4   : > { %v1952_v19 = vadd.f32 %v1936_v12, %v1739_v44 }
 0x4e5   : > { %v2123_v53 = vpack.c.bf16 %v2107_v38, %v2107_v38 }
 0x4e6   : > { %v2104_v1 = vmul.f32 %v2057_v56, %v1952_v19  ;;  %v1793_v19 = vld [vmem:[%s4345_s8 + $0x58] sm:$0xff] }
 0x4e7   : > { %v2230_v28 = vunpack.c.l.b16 %v2123_v53 }
 0x4e8   : > { %v2120_v5 = vpack.c.bf16 %v2104_v1, %v2104_v1  ;;  %v1755_v36 = vpop.permute.xlu0 %1754 }
 0x4ea   : > { %1774 = vrot.lane.b32.xlu1 %v1730_v60, %s3153_s28  ;;  %v2227_v58 = vunpack.c.l.b16 %v2120_v5 }
 0x4eb   : > { %v1849_v31 = vpop.permute.xlu2 %1848 }
 0x4ec   : > { %v2231_v51 = vpack.c.b16 %v2228_v18, %v2227_v58  ;;  %v1889_v52 = vperm.slane %v1849_v31, %v4009_v40 }
 0x4ee   : > { %v1840_v39 = vpop.permute.xlu1 %1839  ;;  %2779 = vmatmul.msk.bf16.vlgmr.msra.gmra.mxu2 %vm2178_vm12, %v2231_v51  ;;  %2781 = vmatmul.msk.bf16.vlgmr.msra.gmra.mxu3 %vm2178_vm12, %v2231_v51 }
 0x4ef   : > { %v1884_v16 = vperm.slane %v1840_v39, %v3998_v61  ;;  %2413 = vmatpush.bf16.msra.mxu2 %v4429_v7  ;;  %2432 = vmatpush.bf16.msra.mxu3 %v4430_v9 }
 0x4f0   : > { %v1858_v50 = vpop.permute.xlu0 %1857 }
 0x4f1   : > { %v1886_v34 = vsel %vm1867_vm9, %v1885_v32, %v1884_v16  ;;  %v1894_v39 = vperm.slane %v1858_v50, %v4012_v55 }
 0x4f2   : > { %2537 = vperm.xlu1 %2868, %v2534_v24   ;;  %v1888_v54 = vsel %vm1871_vm10, %v1887_v2, %v1886_v34 }
 0x4f3   : > { %2414 = vmatpush.bf16.msra.mxu2 %v4431_v47  ;;  %2433 = vmatpush.bf16.msra.mxu3 %v4432_v26  ;;  %v1743_v20 = vpop.permute.xlu2 %1742  ;;  %v1890_v3 = vsel %vm1875_vm11, %v1889_v52, %v1888_v54 }
 0x4f4   : > { %v1954_v27 = vadd.f32 %v1938_v8, %v1743_v20  ;;  %v1940_v43 = vmul.f32 %v1890_v3, %v1790_v0  ;;  %v1941_v25 = vmul.f32 %v1890_v3, %v1791_v17  ;;  %v1943_v10 = vmul.f32 %v1890_v3, %v1793_v19 }
 0x4f5   : > { %v1942_v51 = vmul.f32 %v1890_v3, %v1792_v15 }
 0x4f6   : > { %v2022_v59 = vpop.permute.xlu1 %2021  ;;  %v2106_v49 = vmul.f32 %v2057_v56, %v1954_v27  ;;  %v1956_v48 = vadd.f32 %v1940_v43, %v1755_v36 }
 0x4f7   : > { %v2058_v14 = vperm.slane %v2022_v59, %v3998_v61 }
 0x4f8   : > { %v2122_v29 = vpack.c.bf16 %v2106_v49, %v2106_v49 }
 0x4f9   : > { %v2060_v57 = vsel %vm1867_vm9, %v2059_v21, %v2058_v14 }
 0x4fa   : > { %v2229_v35 = vunpack.c.l.b16 %v2122_v29 }
 0x4fb   : > { %v2028_v22 = vpop.permute.xlu2 %2027 }
 0x4fc   : > { %v2061_v30 = vperm.slane %v2028_v22, %v4012_v55  ;;  %v2232_v46 = vpack.c.b16 %v2230_v28, %v2229_v35 }
 0x4fe   : > { %v2031_v6 = vpop.permute.xlu1 %2030  ;;  %v2062_v23 = vsel %vm1871_vm10, %v2061_v30, %v2060_v57  ;;  %2780 = vmatmul.msk.bf16.gmra.mxu2 %vm2178_vm12, %v2232_v46  ;;  %2782 = vmatmul.msk.bf16.gmra.mxu3 %vm2178_vm12, %v2232_v46  ;;  %v1795_v57 = vld [vmem:[%s4345_s8 + $0x68] sm:$0xff] }
 0x4ff   : > { %v2063_v41 = vperm.slane %v2031_v6, %v4009_v40  ;;  %v1794_v6 = vld [vmem:[%s4345_s8 + $0x60] sm:$0xff] }
 0x500   : > { %v1761_v58 = vpop.permute.xlu0 %1760 }
 0x501   : > { %v2064_v11 = vsel %vm1875_vm11, %v2063_v41, %v2062_v23  ;;  %v1959_v24 = vadd.f32 %v1943_v10, %v1761_v58 }
 0x502   : > { %v2108_v56 = vmul.f32 %v2064_v11, %v1956_v48 }
 0x503   : > { %v1757_v4 = vpop.permute.xlu2 %1756  ;;  %v2111_v32 = vmul.f32 %v2064_v11, %v1959_v24 }
 0x504   : > { %v1957_v45 = vadd.f32 %v1941_v25, %v1757_v4  ;;  %v2124_v42 = vpack.c.bf16 %v2108_v56, %v2108_v56 }
 0x505   : > { %v2127_v8 = vpack.c.bf16 %v2111_v32, %v2111_v32 }
 0x506   : > { %v1855_v12 = vpop.permute.xlu1 %1854  ;;  %v2109_v44 = vmul.f32 %v2064_v11, %v1957_v45  ;;  %v2301_v60 = vunpack.c.l.b16 %v2124_v42 }
 0x507   : > { %v1892_v31 = vperm.slane %v1855_v12, %v4002_v13  ;;  %v2304_v47 = vunpack.c.l.b16 %v2127_v8 }
 0x508   : > { %v2125_v1 = vpack.c.bf16 %v2109_v44, %v2109_v44  ;;  %v1796_v44 = vld [vmem:[%s4345_s8 + $0x70] sm:$0xff] }
 0x50a   : > { %v2302_v5 = vunpack.c.l.b16 %v2125_v1 }
 0x50b   : > { %v1852_v18 = vpop.permute.xlu2 %1851 }
 0x50c   : > { %v2305_v33 = vpack.c.b16 %v2302_v5, %v2301_v60  ;;  %v1891_v62 = vperm.slane %v1852_v18, %v3998_v61 }
 0x50e   : > { %v1759_v37 = vpop.permute.xlu1 %1758  ;;  %v1893_v16 = vsel %vm1867_vm9, %v1892_v31, %v1891_v62  ;;  %2783 = vmatmul.msk.bf16.vlgmr.msrb.gmra.mxu2 %vm2178_vm12, %v2305_v33  ;;  %2785 = vmatmul.msk.bf16.vlgmr.msrb.gmra.mxu3 %vm2178_vm12, %v2305_v33 }
 0x50f   : > { %v1958_v7 = vadd.f32 %v1942_v51, %v1759_v37  ;;  %v1895_v9 = vsel %vm1871_vm10, %v1894_v39, %v1893_v16 }
 0x511   : > { %v2110_v63 = vmul.f32 %v2064_v11, %v1958_v7 }
 0x513   : > { %v2126_v38 = vpack.c.bf16 %v2110_v63, %v2110_v63  ;;  %v1861_v29 = vpop.permute.xlu2 %1860 }
 0x514   : > { %v1896_v22 = vperm.slane %v1861_v29, %v4009_v40 }
 0x515   : > { %v2303_v34 = vunpack.c.l.b16 %v2126_v38 }
 0x516   : > { %v2034_v21 = vpop.permute.xlu1 %2033  ;;  %v1897_v46 = vsel %vm1875_vm11, %v1896_v22, %v1895_v9 }
 0x517   : > { %v2306_v26 = vpack.c.b16 %v2304_v47, %v2303_v34  ;;  %v2065_v43 = vperm.slane %v2034_v21, %v3998_v61  ;;  %v1945_v48 = vmul.f32 %v1897_v46, %v1795_v57  ;;  %v1946_v60 = vmul.f32 %v1897_v46, %v1796_v44 }
 0x51b   : > { %v2040_v28 = vpop.permute.xlu2 %2039 }
 0x51c   : > { %v2068_v11 = vperm.slane %v2040_v28, %v4012_v55 }
 0x51e   : > { %2784 = vmatmul.msk.bf16.gmra.mxu2 %vm2178_vm12, %v2306_v26  ;;  %2786 = vmatmul.msk.bf16.gmra.mxu3 %vm2178_vm12, %v2306_v26 }
 0x523   : > { %v1773_v23 = vpop.permute.xlu2 %1772 }
 0x524   : > { %v1961_v61 = vadd.f32 %v1945_v48, %v1773_v23 }
 0x52b   : > { %v4238_v20 = vpop.f32.mrf.mxu3 }
 0x52c   : > { %v4240_v2 = vpop.f32.mrf.mxu2 }
 0x533   : > { %v4242_v27 = vpop.f32.mrf.mxu3 }
 0x534   : > { %v4244_v59 = vpop.f32.mrf.mxu2  ;;  %v2447_v53 = vpack.c.bf16 %v4242_v27, %v4238_v20 }
 0x535   : > { %v2446_v54 = vpack.c.bf16 %v4244_v59, %v4240_v2 }
 0x53b   : > { %v4250_v49 = vpop.f32.mrf.mxu3 }
 0x53c   : > { %v4252_v52 = vpop.f32.mrf.mxu2 }
 0x541   : > { %v2037_v35 = vpop.permute.xlu0 %2036 }
 0x542   : > { %v2066_v30 = vperm.slane %v2037_v35, %v4002_v13  ;;  %v1944_v13 = vmul.f32 %v1897_v46, %v1794_v6 }
 0x543   : > { %v4254_v36 = vpop.f32.mrf.mxu3 }
 0x544   : > { %v4256_v14 = vpop.f32.mrf.mxu2  ;;  %v2449_v0 = vpack.c.bf16 %v4254_v36, %v4250_v49  ;;  %v2067_v41 = vsel %vm1867_vm9, %v2066_v30, %v2065_v43 }
 0x545   : > { %v2448_v3 = vpack.c.bf16 %v4256_v14, %v4252_v52  ;;  %v2069_v4 = vsel %vm1871_vm10, %v2068_v11, %v2067_v41  ;;  %v2466_v52 = vpop.permute.xlu2 %2465 }
 0x549   : > { %v1771_v17 = vpop.permute.xlu0 %1770 }
 0x54a   : > { %v1960_v50 = vadd.f32 %v1944_v13, %v1771_v17 }
 0x551   : > { %v1777_v18 = vpop.permute.xlu0 %1776 }
 0x554   : > { %v2043_v25 = vpop.permute.xlu1 %2042 }
 0x555   : > { %v2070_v56 = vperm.slane %v2043_v25, %v4009_v40  ;;  %v1797_v40 = vld [vmem:[%s4345_s8 + $0x78] sm:$0xff] }
 0x556   : > { %v1947_v33 = vmul.f32 %v1897_v46, %v1797_v40 }
 0x557   : > { %v2071_v45 = vsel %vm1875_vm11, %v2070_v56, %v2069_v4 }
 0x558   : > { %v2112_v12 = vmul.f32 %v2071_v45, %v1960_v50  ;;  %v2113_v42 = vmul.f32 %v2071_v45, %v1961_v61  ;;  %v1963_v31 = vadd.f32 %v1947_v33, %v1777_v18 }
 0x55a   : > { %v2128_v19 = vpack.c.bf16 %v2112_v12, %v2112_v12  ;;  %v2129_v1 = vpack.c.bf16 %v2113_v42, %v2113_v42  ;;  %v2115_v51 = vmul.f32 %v2071_v45, %v1963_v31 }
 0x55c   : > { %v2375_v55 = vunpack.c.l.b16 %v2128_v19  ;;  %v2376_v15 = vunpack.c.l.b16 %v2129_v1  ;;  %v1775_v5 = vpop.permute.xlu1 %1774  ;;  %v2131_v37 = vpack.c.bf16 %v2115_v51, %v2115_v51 }
 0x55d   : > { %v1962_v58 = vadd.f32 %v1946_v60, %v1775_v5 }
 0x55e   : > { %v2379_v10 = vpack.c.b16 %v2376_v15, %v2375_v55  ;;  %v2378_v16 = vunpack.c.l.b16 %v2131_v37  ;;  %v2445_v15 = vld [vmem:[%s4339_s2] sm:$0x3] }
 0x55f   : > { %v2114_v62 = vmul.f32 %v2071_v45, %v1962_v58 }
 0x560   : > { %2787 = vmatmul.msk.bf16.vlgmr.msra.gmra.mxu2 %vm2178_vm12, %v2379_v10  ;;  %2789 = vmatmul.msk.bf16.vlgmr.msra.gmra.mxu3 %vm2178_vm12, %v2379_v10 }
 0x561   : > { %v2130_v39 = vpack.c.bf16 %v2114_v62, %v2114_v62 }
 0x563   : > { %v2377_v24 = vunpack.c.l.b16 %v2130_v39 }
 0x565   : > { %v2380_v7 = vpack.c.b16 %v2378_v16, %v2377_v24 }
 0x570   : > { %2788 = vmatmul.msk.bf16.gmra.mxu2 %vm2178_vm12, %v2380_v7  ;;  %2790 = vmatmul.msk.bf16.gmra.mxu3 %vm2178_vm12, %v2380_v7 }
 0x571   : > { %v2268_v9 = vpop.f32.mrf.mxu2  ;;  %v2287_v63 = vpop.f32.mrf.mxu3 }
 0x579   : > { %v2270_v32 = vpop.f32.mrf.mxu2  ;;  %v2289_v38 = vpop.f32.mrf.mxu3 }
 0x57a   : > { %v2450_v8 = vpack.c.bf16 %v2270_v32, %v2268_v9  ;;  %v2451_v34 = vpack.c.bf16 %v2289_v38, %v2287_v63 }
 0x581   : > { %v2273_v47 = vpop.f32.mrf.mxu2  ;;  %v2292_v26 = vpop.f32.mrf.mxu3 }
 0x589   : > { %v2275_v29 = vpop.f32.mrf.mxu2  ;;  %v2294_v28 = vpop.f32.mrf.mxu3 }
 0x58a   : > { %v2452_v35 = vpack.c.bf16 %v2275_v29, %v2273_v47  ;;  %v2453_v21 = vpack.c.bf16 %v2294_v28, %v2292_v26 }
 0x591   : > { %v2342_v22 = vpop.f32.mrf.mxu2  ;;  %v2361_v30 = vpop.f32.mrf.mxu3 }
 0x599   : > { %v2344_v46 = vpop.f32.mrf.mxu2  ;;  %v2363_v43 = vpop.f32.mrf.mxu3 }
 0x59a   : > { %v2454_v1 = vpack.c.bf16 %v2344_v46, %v2342_v22  ;;  %v2455_v55 = vpack.c.bf16 %v2363_v43, %v2361_v30  ;;  %v2538_v46 = vpop.permute.xlu1 %2537 }
 0x5a1   : > { %v2347_v57 = vpop.f32.mrf.mxu2  ;;  %v2366_v6 = vpop.f32.mrf.mxu3 }
 0x5a9   : > { %v2349_v23 = vpop.f32.mrf.mxu2  ;;  %v2368_v41 = vpop.f32.mrf.mxu3 }
 0x5aa   : > { %v2456_v44 = vpack.c.bf16 %v2349_v23, %v2347_v57  ;;  %v2457_v19 = vpack.c.bf16 %v2368_v41, %v2366_v6 }
 0x5e3   : > { %v2416_v17 = vpop.f32.mrf.mxu2  ;;  %v2435_v11 = vpop.f32.mrf.mxu3 }
 0x5eb   : > { %v2418_v48 = vpop.f32.mrf.mxu2  ;;  %v2437_v13 = vpop.f32.mrf.mxu3 }
 0x5ec   : > { %v2458_v12 = vpack.c.bf16 %v2418_v48, %v2416_v17  ;;  %v2459_v42 = vpack.c.bf16 %v2437_v13, %v2435_v11 }
 0x5f3   : > { %v2421_v25 = vpop.f32.mrf.mxu2  ;;  %v2440_v56 = vpop.f32.mrf.mxu3 }
 0x5fb   : > { %v2423_v61 = vpop.f32.mrf.mxu2  ;;  %v2442_v50 = vpop.f32.mrf.mxu3 }
 0x5fc   : > { %v2460_v4 = vpack.c.bf16 %v2423_v61, %v2421_v25  ;;  %v2461_v45 = vpack.c.bf16 %v2442_v50, %v2440_v56 }
 0x5fe   : > { %2468 = vmatpush.bf16.msrb.mxu2 %v2460_v4  ;;  %2481 = vmatpush.bf16.msrb.mxu3 %v2461_v45 }
 0x602   : > { %2469 = vmatpush.bf16.msrb.mxu2 %v2458_v12  ;;  %2482 = vmatpush.bf16.msrb.mxu3 %v2459_v42 }
 0x606   : > { %2470 = vmatpush.bf16.msrb.mxu2 %v2456_v44  ;;  %2483 = vmatpush.bf16.msrb.mxu3 %v2457_v19 }
 0x60a   : > { %2471 = vmatpush.bf16.msrb.mxu2 %v2454_v1  ;;  %2484 = vmatpush.bf16.msrb.mxu3 %v2455_v55 }
 0x60e   : > { %2472 = vmatpush.bf16.msrb.mxu2 %v2452_v35  ;;  %2485 = vmatpush.bf16.msrb.mxu3 %v2453_v21 }
 0x612   : > { %2473 = vmatpush.bf16.msrb.mxu2 %v2450_v8  ;;  %2486 = vmatpush.bf16.msrb.mxu3 %v2451_v34 }
 0x616   : > { %2474 = vmatpush.bf16.msrb.mxu2 %v2448_v3  ;;  %2487 = vmatpush.bf16.msrb.mxu3 %v2449_v0 }
 0x61a   : > { %2475 = vmatpush.bf16.msrb.mxu2 %v2446_v54  ;;  %2488 = vmatpush.bf16.msrb.mxu3 %v2447_v53 }
 0x61d   : > { %2476 = vmatmul.bf16.vlgmr.msrb.gmra.mxu2 %v2445_v15  ;;  %2489 = vmatmul.bf16.vlgmr.msrb.gmra.mxu3 %v2445_v15 }
 0x6a0   : > { %v2477_v14 = vpop.f32.mrf.mxu2  ;;  %v2490_v3 = vpop.f32.mrf.mxu3 }
 0x6a1   : > { %v2478_v60 = vadd.f32 %v2477_v14, %v2466_v52  ;;  %v2491_v49 = vadd.f32 %v2490_v3, %v2466_v52 }
 0x6a3   : > { %v2494_v36 = vmul.f32 %v2478_v60, %v2478_v60  ;;  %v2495_v0 = vmul.f32 %v2491_v49, %v2491_v49 }
 0x6a5   : > { %v2496_v2 = vsel %vm340_vm0, %v2494_v36, 0.0  ;;  %v2503_v59 = vsel %vm340_vm0, %v2495_v0, 0.0 }
 0x6a6   : > { %v2497_v54 = vrot.slane %v2496_v2, 4  ;;  %v2504_v20 = vrot.slane %v2503_v59, 4 }
 0x6a8   : > { %v2498_v27 = vadd.f32 %v2497_v54, %v2496_v2  ;;  %v2505_v53 = vadd.f32 %v2504_v20, %v2503_v59  ;;  %v2479_v5 = vpop.f32.mrf.mxu2  ;;  %v2492_v40 = vpop.f32.mrf.mxu3 }
 0x6aa   : > { %v2499_v10 = vrot.slane %v2498_v27, 2  ;;  %v2506_v58 = vrot.slane %v2505_v53, 2 }
 0x6ac   : > { %v2500_v18 = vadd.f32 %v2499_v10, %v2498_v27  ;;  %v2507_v33 = vadd.f32 %v2506_v58, %v2505_v53 }
 0x6ae   : > { %v2501_v31 = vrot.slane %v2500_v18, 1  ;;  %v2508_v62 = vrot.slane %v2507_v33, 1 }
 0x6b0   : > { %v2502_v51 = vadd.f32 %v2501_v31, %v2500_v18  ;;  %v2509_v39 = vadd.f32 %v2508_v62, %v2507_v33 }
 0x6b2   : > { %v2510_v37 = vmax.f32 %v2502_v51, 1e-24  ;;  %v2511_v24 = vmax.f32 %v2509_v39, 1e-24 }
 0x6b4   : > { %3081 = vrsqrt.f32 %v2510_v37  ;;  %vm2518_vm15 = vweird.f32 %v2510_v37  ;;  %vm2528_vm2 = vweird.f32 %v2511_v24 }
 0x6b5   : > { %3083 = vrsqrt.f32 %v2511_v24 }
 0x6ba   : > { %v3082_v16 = vpop.eup %3081 }
 0x6bb   : > { %v3084_v7 = vpop.eup %3083  ;;  %v2513_v9 = vmul.f32 %v3082_v16, %v2510_v37  ;;  %vm2519_vm13 = vweird.f32 %v3082_v16 }
 0x6bc   : > { %v2523_v63 = vmul.f32 %v3084_v7, %v2511_v24  ;;  %vm2529_vm14 = vweird.f32 %v3084_v7  ;;  %vm2520_vm1 = vmor %vm2518_vm15, %vm2519_vm13 }
 0x6bd   : > { %v2514_v32 = vmul.f32 %v3082_v16, %v2513_v9  ;;  %vm2530_vm3 = vmor %vm2528_vm2, %vm2529_vm14 }
 0x6be   : > { %v2524_v38 = vmul.f32 %v3084_v7, %v2523_v63 }
 0x6bf   : > { %v2515_v8 = vmul.f32 0.5, %v2514_v32 }
 0x6c0   : > { %v2525_v34 = vmul.f32 0.5, %v2524_v38 }
 0x6c1   : > { %v2516_v47 = vsub.f32 1.5, %v2515_v8 }
 0x6c2   : > { %v2526_v26 = vsub.f32 1.5, %v2525_v34 }
 0x6c3   : > { %v2517_v29 = vmul.f32 %v3082_v16, %v2516_v47 }
 0x6c4   : > { %v2527_v28 = vmul.f32 %v3084_v7, %v2526_v26 }
 0x6c5   : > { %v2521_v35 = vsel %vm2520_vm1, %v3082_v16, %v2517_v29 }
 0x6c6   : > { %v2531_v21 = vsel %vm2530_vm3, %v3084_v7, %v2527_v28  ;;  %v2532_v22 = vmul.f32 %v2521_v35, %v2478_v60 }
 0x6c7   : > { %v2533_v30 = vmul.f32 %v2531_v21, %v2491_v49 }
 0x6c8   : > { %v2540_v57 = vmul.f32 %v2538_v46, %v2532_v22 }
 0x6c9   : > { %v2541_v43 = vmul.f32 %v2538_v46, %v2533_v30 }
 0x6cb   : > { %v2544_v6 = vrot.slane %v2541_v43, 4 }
 0x6cd   : > { %v2545_v23 = vsel %vm340_vm0, %v2540_v57, %v2544_v6 }
 0x6ce   : > { %2547 = vst [vmem:[%s325_s16] sm:$0xff] %v2545_v23 }
 0x6cf   : > { %3112 = shalt.err (!%p3109_p3)
}
 0x6d0   : > { %2822 = dma.vmem_to_hbm [thread:$0]  (%p3242_p5), %s2563_s17, 128, %s2565_s21, %s2549_s13  }
 0x6d1 PF: > { %p2828_p4 = scmp.ge.s32.totalorder %s3147_s12, 2  ;;  %s2576_s26 = sand.u32 1, %s3135_s30  }
 0x6d2   : > { %s2577_s14 = scalar_lea.sflag [#allocation3], %s2576_s26 }
 0x6d3   : > { %p2825_p7 = pnand %p2828_p4, %p3246_p6 }
 0x6d5   : > { %p2826_p8 = pneg %p2825_p7 }
 0x6d7   : > { %3130 = dma.done.wait (%p2826_p8), %s2577_s14, 128  }
 0x6d8   : > { %3132 = vsyncadd (%p2826_p8), %s2577_s14, 4294967168  ;;  %p19_p9 = scmp.ge.s32.totalorder %s3229_s15, 4   ;;  %s4433_s30 = smov %s3139_s10 }
 0x6d9   : > { %s4434_s10 = smov %s3143_s11  ;;  %s4435_s11 = smov %s3240_s18 }
 0x6da   : > { %s4436_s12 = smov %s3229_s15  ;;  %21 = sbr.rel (!%p19_p9) target bundleno = 3 (0x3), region = 91 }
 0x6df   :  { %2583 = vsyncpa [#allocation3], 1 }
 0x6e0   :  { %2585 = vsyncpa [#allocation3 + $0x1], 1 }

</bundles_post_ra>
